<compile_context>
chip_gen: v7x
topology: tpu7x:2x2x1
jax: 0.10.0
libtpu: 0.0.40
codegen_flags: <defaults>
</compile_context>

<pallas_src>
import jax
import jax.numpy as jnp
from jax.experimental import pallas as pl
from jax.experimental.pallas import tpu as pltpu

IN_DIM = 28 * 28   # 784
HID = 500
OUT_DIM = 26

HID_PAD = 512      # 500 -> 512: exact 4x128 lanes, no masked edge handling
OUT_PAD = 128      # 26  -> 128: one full lane width -> unmasked output stores
TB_MAX = 256       # batch tile: fills v6e/v7x MXU M dim; also fine (2x128) on v5e


def mlp_kernel(x_ref, w1_ref, b1_ref, w2_ref, b2_ref, w3_ref, b3_ref, o_ref):
    # x:  (TB, 784)  bf16                         (streamed per batch tile)
    # w1: (784, 512) bf16   b1: (1, 512) f32      (resident across tiles)
    # w2: (512, 512) bf16   b2: (1, 512) f32
    # w3: (512, 128) bf16   b3: (1, 128) f32
    # o:  (TB, 128)  f32    (padded logits; sliced to 26 in the wrapper)
    x = x_ref[...]
    h1 = jnp.dot(x, w1_ref[...], preferred_element_type=jnp.float32) + b1_ref[...]
    h1 = jnp.maximum(h1, 0.0).astype(jnp.bfloat16)                      # ReLU
    h2 = jnp.dot(h1, w2_ref[...], preferred_element_type=jnp.float32) + b2_ref[...]
    h2 = jnp.maximum(h2, 0.0).astype(jnp.bfloat16)                      # ReLU
    logits = jnp.dot(h2, w3_ref[...], preferred_element_type=jnp.float32) + b3_ref[...]
    o_ref[...] = logits.astype(o_ref.dtype)


def prepare_params(params):
    """Zero-pad to lane-aligned widths and cast weights to bf16 (biases stay f32)."""
    w1, b1, w2, b2, w3, b3 = params
    w1p = jnp.zeros((IN_DIM, HID_PAD), jnp.bfloat16).at[:, :HID].set(w1.astype(jnp.bfloat16))
    b1p = jnp.zeros((1, HID_PAD), jnp.float32).at[:, :HID].set(b1)
    w2p = jnp.zeros((HID_PAD, HID_PAD), jnp.bfloat16).at[:HID, :HID].set(w2.astype(jnp.bfloat16))
    b2p = jnp.zeros((1, HID_PAD), jnp.float32).at[:, :HID].set(b2)
    w3p = jnp.zeros((HID_PAD, OUT_PAD), jnp.bfloat16).at[:HID, :OUT_DIM].set(w3.astype(jnp.bfloat16))
    b3p = jnp.zeros((1, OUT_PAD), jnp.float32).at[:, :OUT_DIM].set(b3)
    return w1p, b1p, w2p, b2p, w3p, b3p


def mlp_forward(x, params):
    """x: (B, 1, 28, 28) float32 (NCHW, like the PyTorch module). Returns (B, 26) f32 logits."""
    B = x.shape[0]
    x_flat = x.reshape(B, -1).astype(jnp.bfloat16)   # nn.Flatten + bf16 operand cast
    assert x_flat.shape[1] == IN_DIM

    w1, b1, w2, b2, w3, b3 = prepare_params(params)

    # Pick a sublane-aligned batch tile; pad the batch to a whole number of tiles.
    if B >= TB_MAX:
        TB = TB_MAX
    else:
        TB = max(8, ((B + 7) // 8) * 8)
    Bp = pl.cdiv(B, TB) * TB
    if Bp != B:
        x_flat = jnp.pad(x_flat, ((0, Bp - B), (0, 0)))

    resident = lambda shape: pl.BlockSpec(shape, lambda i: (0, 0))  # one DMA, stays in VMEM

    out_padded = pl.pallas_call(
        mlp_kernel,
        out_shape=jax.ShapeDtypeStruct((Bp, OUT_PAD), jnp.float32),
        grid=(Bp // TB,),
        in_specs=[
            pl.BlockSpec((TB, IN_DIM), lambda i: (i, 0)),   # x: streamed batch tiles
            resident((IN_DIM, HID_PAD)), resident((1, HID_PAD)),
            resident((HID_PAD, HID_PAD)), resident((1, HID_PAD)),
            resident((HID_PAD, OUT_PAD)), resident((1, OUT_PAD)),
        ],
        out_specs=pl.BlockSpec((TB, OUT_PAD), lambda i: (i, 0)),
        compiler_params=pltpu.CompilerParams(
            dimension_semantics=("parallel",),   # lets v7x shard batch tiles over its 2 TCs
        ),
    )(x_flat, w1, b1, w2, b2, w3, b3)

    return out_padded[:B, :OUT_DIM]


def init_params(key):
    """Deterministic init mirroring torch.nn.Linear default: U(-1/sqrt(fan_in), 1/sqrt(fan_in))."""
    def linear(key, fan_in, fan_out):
        kw, kb = jax.random.split(key)
        bound = 1.0 / jnp.sqrt(fan_in)
        # stored as (in, out) so the kernel does x @ W
        w = jax.random.uniform(kw, (fan_in, fan_out), jnp.float32, -bound, bound)
        b = jax.random.uniform(kb, (1, fan_out), jnp.float32, -bound, bound)
        return w, b

    k1, k2, k3 = jax.random.split(key, 3)
    w1, b1 = linear(k1, IN_DIM, HID)
    w2, b2 = linear(k2, HID, HID)
    w3, b3 = linear(k3, HID, OUT_DIM)
    return (w1, b1, w2, b2, w3, b3)


def mlp_reference(x, params):
    """Pure-JAX f32 reference for correctness check."""
    w1, b1, w2, b2, w3, b3 = params
    h = x.reshape(x.shape[0], -1)
    h = jnp.maximum(h @ w1 + b1, 0.0)
    h = jnp.maximum(h @ w2 + b2, 0.0)
    return h @ w3 + b3


if __name__ == "__main__":
    key = jax.random.PRNGKey(0)
    kp, kx = jax.random.split(key)

    params = init_params(kp)
    # Small MNIST-like batch, NCHW as the PyTorch module would see it.
    x = jax.random.normal(kx, (8, 1, 28, 28), jnp.float32)

    logits = mlp_forward(x, params)
    jax.block_until_ready(logits)

    ref = mlp_reference(x, params)
    assert logits.shape == (8, 26)
    # bf16 operands (f32 accumulation) -> loosened tolerance vs the f32 reference.
    max_err = jnp.max(jnp.abs(logits - ref))
    assert jnp.allclose(logits, ref, atol=5e-2, rtol=5e-2), f"mismatch vs reference (max err {max_err})"

    print("KERNEL_OK")
</pallas_src>

<mosaic_0001>
module attributes {stable_mosaic.version = 11 : i64} {
  func.func @mlp_kernel(%arg0: i32, %arg1: memref<8x784xbf16, #tpu.memory_space<vmem>>, %arg2: memref<784x512xbf16, #tpu.memory_space<vmem>>, %arg3: memref<1x512xf32, #tpu.memory_space<vmem>>, %arg4: memref<512x512xbf16, #tpu.memory_space<vmem>>, %arg5: memref<1x512xf32, #tpu.memory_space<vmem>>, %arg6: memref<512x128xbf16, #tpu.memory_space<vmem>>, %arg7: memref<1x128xf32, #tpu.memory_space<vmem>>, %arg8: memref<8x128xf32, #tpu.memory_space<vmem>>) attributes {dimension_semantics = [#tpu.dimension_semantics<parallel>], iteration_bounds = array<i64: 1>, scalar_prefetch = 0 : i64, scratch_operands = 0 : i64, tpu.core_type = #tpu.core_type<tc>, window_params = [{transform_indices = @transform_0, window_bounds = array<i64: 8, 784>}, {pipeline_mode = #tpu.pipeline_mode<synchronous>, transform_indices = @transform_1, window_bounds = array<i64: 784, 512>}, {pipeline_mode = #tpu.pipeline_mode<synchronous>, transform_indices = @transform_2, window_bounds = array<i64: 1, 512>}, {pipeline_mode = #tpu.pipeline_mode<synchronous>, transform_indices = @transform_3, window_bounds = array<i64: 512, 512>}, {pipeline_mode = #tpu.pipeline_mode<synchronous>, transform_indices = @transform_4, window_bounds = array<i64: 1, 512>}, {pipeline_mode = #tpu.pipeline_mode<synchronous>, transform_indices = @transform_5, window_bounds = array<i64: 512, 128>}, {pipeline_mode = #tpu.pipeline_mode<synchronous>, transform_indices = @transform_6, window_bounds = array<i64: 1, 128>}, {transform_indices = @transform_7, window_bounds = array<i64: 8, 128>}]} {
    %c0 = arith.constant 0 : index
    %c0_0 = arith.constant 0 : index
    %0 = vector.load %arg1[%c0, %c0_0] : memref<8x784xbf16, #tpu.memory_space<vmem>>, vector<8x784xbf16>
    %c0_1 = arith.constant 0 : index
    %c0_2 = arith.constant 0 : index
    %1 = vector.load %arg2[%c0_1, %c0_2] : memref<784x512xbf16, #tpu.memory_space<vmem>>, vector<784x512xbf16>
    %cst = arith.constant dense<0.000000e+00> : vector<8x512xf32>
    %2 = tpu.matmul %0, %1, %cst {dimension_numbers = #tpu.dot_dimension_numbers<[1], [0], [0], [1], [0, 0, 1, 1], [], []>} : vector<8x784xbf16>, vector<784x512xbf16>, vector<8x512xf32> -> vector<8x512xf32>
    %c0_3 = arith.constant 0 : index
    %c0_4 = arith.constant 0 : index
    %3 = vector.load %arg3[%c0_3, %c0_4] : memref<1x512xf32, #tpu.memory_space<vmem>>, vector<1x512xf32>
    %4 = vector.broadcast %3 : vector<1x512xf32> to vector<8x512xf32>
    %5 = arith.addf %2, %4 : vector<8x512xf32>
    %cst_5 = arith.constant 0.000000e+00 : f32
    %6 = vector.broadcast %cst_5 : f32 to vector<8x512xf32>
    %7 = arith.maximumf %5, %6 : vector<8x512xf32>
    %8 = arith.truncf %7 : vector<8x512xf32> to vector<8x512xbf16>
    %c0_6 = arith.constant 0 : index
    %c0_7 = arith.constant 0 : index
    %9 = vector.load %arg4[%c0_6, %c0_7] : memref<512x512xbf16, #tpu.memory_space<vmem>>, vector<512x512xbf16>
    %cst_8 = arith.constant dense<0.000000e+00> : vector<8x512xf32>
    %10 = tpu.matmul %8, %9, %cst_8 {dimension_numbers = #tpu.dot_dimension_numbers<[1], [0], [0], [1], [0, 0, 1, 1], [], []>} : vector<8x512xbf16>, vector<512x512xbf16>, vector<8x512xf32> -> vector<8x512xf32>
    %c0_9 = arith.constant 0 : index
    %c0_10 = arith.constant 0 : index
    %11 = vector.load %arg5[%c0_9, %c0_10] : memref<1x512xf32, #tpu.memory_space<vmem>>, vector<1x512xf32>
    %12 = vector.broadcast %11 : vector<1x512xf32> to vector<8x512xf32>
    %13 = arith.addf %10, %12 : vector<8x512xf32>
    %cst_11 = arith.constant 0.000000e+00 : f32
    %14 = vector.broadcast %cst_11 : f32 to vector<8x512xf32>
    %15 = arith.maximumf %13, %14 : vector<8x512xf32>
    %16 = arith.truncf %15 : vector<8x512xf32> to vector<8x512xbf16>
    %c0_12 = arith.constant 0 : index
    %c0_13 = arith.constant 0 : index
    %17 = vector.load %arg6[%c0_12, %c0_13] : memref<512x128xbf16, #tpu.memory_space<vmem>>, vector<512x128xbf16>
    %cst_14 = arith.constant dense<0.000000e+00> : vector<8x128xf32>
    %18 = tpu.matmul %16, %17, %cst_14 {dimension_numbers = #tpu.dot_dimension_numbers<[1], [0], [0], [1], [0, 0, 1, 1], [], []>} : vector<8x512xbf16>, vector<512x128xbf16>, vector<8x128xf32> -> vector<8x128xf32>
    %c0_15 = arith.constant 0 : index
    %c0_16 = arith.constant 0 : index
    %19 = vector.load %arg7[%c0_15, %c0_16] : memref<1x128xf32, #tpu.memory_space<vmem>>, vector<1x128xf32>
    %20 = vector.broadcast %19 : vector<1x128xf32> to vector<8x128xf32>
    %21 = arith.addf %18, %20 : vector<8x128xf32>
    %c0_17 = arith.constant 0 : index
    %c0_18 = arith.constant 0 : index
    %22 = vector.load %arg8[%c0_17, %c0_18] : memref<8x128xf32, #tpu.memory_space<vmem>>, vector<8x128xf32>
    tpu.vector_store %arg8[%c0_17, %c0_18], %21 {strides = array<i32>} : memref<8x128xf32, #tpu.memory_space<vmem>>, vector<8x128xf32>,
    return
  }
  func.func @transform_0(%arg0: i32) -> (i32, i32) {
    %c0_i32 = arith.constant 0 : i32
    %c0_i32_0 = arith.constant 0 : i32
    return %arg0, %c0_i32 : i32, i32
  }
  func.func @transform_1(%arg0: i32) -> (i32, i32) {
    %c0_i32 = arith.constant 0 : i32
    %c0_i32_0 = arith.constant 0 : i32
    %c0_i32_1 = arith.constant 0 : i32
    return %c0_i32, %c0_i32_0 : i32, i32
  }
  func.func @transform_2(%arg0: i32) -> (i32, i32) {
    %c0_i32 = arith.constant 0 : i32
    %c0_i32_0 = arith.constant 0 : i32
    %c0_i32_1 = arith.constant 0 : i32
    return %c0_i32, %c0_i32_0 : i32, i32
  }
  func.func @transform_3(%arg0: i32) -> (i32, i32) {
    %c0_i32 = arith.constant 0 : i32
    %c0_i32_0 = arith.constant 0 : i32
    %c0_i32_1 = arith.constant 0 : i32
    return %c0_i32, %c0_i32_0 : i32, i32
  }
  func.func @transform_4(%arg0: i32) -> (i32, i32) {
    %c0_i32 = arith.constant 0 : i32
    %c0_i32_0 = arith.constant 0 : i32
    %c0_i32_1 = arith.constant 0 : i32
    return %c0_i32, %c0_i32_0 : i32, i32
  }
  func.func @transform_5(%arg0: i32) -> (i32, i32) {
    %c0_i32 = arith.constant 0 : i32
    %c0_i32_0 = arith.constant 0 : i32
    %c0_i32_1 = arith.constant 0 : i32
    return %c0_i32, %c0_i32_0 : i32, i32
  }
  func.func @transform_6(%arg0: i32) -> (i32, i32) {
    %c0_i32 = arith.constant 0 : i32
    %c0_i32_0 = arith.constant 0 : i32
    %c0_i32_1 = arith.constant 0 : i32
    return %c0_i32, %c0_i32_0 : i32, i32
  }
  func.func @transform_7(%arg0: i32) -> (i32, i32) {
    %c0_i32 = arith.constant 0 : i32
    %c0_i32_0 = arith.constant 0 : i32
    return %arg0, %c0_i32 : i32, i32
  }
}

</mosaic_0001>

<bundles_post_ra>
// kernel: tpu_custom_call.1
= control target key start
LH: loop header
LB: loop body
LE: loop exit
PB: predicated region body
PF: predicated region fallthrough
CT: control target
= control target key end

     0   :  { %12 = vsyncpa [#allocation3], 0  ;;  %s4241_s0 = inlined_call_operand.hbm [shape: bf16[8,784], index: 0, kind: input, shape index: {}]   ;;  %s4242_s1 = inlined_call_operand.hbm [shape: bf16[784,512], index: 1, kind: input, shape index: {}]   ;;  %s4243_s2 = inlined_call_operand.vmem [shape: f32[1,512], index: 2, kind: input, shape index: {}]   ;;  %s4244_s3 = inlined_call_operand.hbm [shape: bf16[512,512], index: 3, kind: input, shape index: {}]   ;;  %s4245_s4 = inlined_call_operand.vmem [shape: f32[1,512], index: 4, kind: input, shape index: {}]   ;;  %s4246_s5 = inlined_call_operand.hbm [shape: bf16[512,128], index: 5, kind: input, shape index: {}]   ;;  %s4247_s6 = inlined_call_operand.vmem [shape: f32[1,128], index: 6, kind: input, shape index: {}]   ;;  %s4248_s7 = inlined_call_operand.hbm [shape: f32[8,128], index: 7, kind: output, shape index: {}]  }
   0x1   :  { %13 = vsyncpa [#allocation6], 0 }
   0x2   :  { %14 = vsyncpa [#allocation9], 0 }
   0x3   :  { %15 = vsyncpa [#allocation4], 0  ;;  %s4073_s24 = smov [#allocation5]   ;;  %s3955_s28 = scalar_lea.hbm %s4242_s1, 25088 }
   0x4   :  { %s31_s25 = sshll.u32 %s4073_s24, 4  ;;  %p3956_p0 = scmp.ne.s32.totalorder %s4242_s1, %s3955_s28  ;;  %s32_s25 = int_to_ptr.vmem [resolvable:$true] %s31_s25 }
   0x5   :  { %p3959_p1 = scmp.lt.u32.totalorder %s3955_s28, %s4242_s1 }
   0x7   :  { %p3961_p2 = pnand %p3959_p1, %p3956_p0 }
   0x9   :  { %3964 = shalt.err (!%p3961_p2)
}
   0xa   :  { %s3965_s10 = scalar_lea.vmem %s32_s25, 25088  ;;  %p3970_p4 = scmp.lt.s32.totalorder %s32_s25, %s32_s25 }
   0xb   :  { %p3966_p3 = scmp.ne.s32.totalorder %s32_s25, %s3965_s10  ;;  %p3971_p5 = scmp.lt.s32.totalorder %s3965_s10, %s3965_s10 }
   0xd   :  { %p3972_p6 = por %p3971_p5, %p3970_p4 }
   0xf   :  { %p3973_p7 = pnand %p3972_p6, %p3966_p3 }
  0x11   :  { %3976 = shalt.err (!%p3973_p7)
}
  0x12   :  { %s4074_s11 = smov 256   ;;  %s4075_s12 = smov 16  }
  0x13   :  { %37 = dma.hbm_to_vmem [thread:$0]  %s4242_s1, 25088, %s32_s25, [#allocation6], %s4074_s11, %s4074_s11, %s4075_s12  }
  0x14   :  { %s4076_s15 = smov [#allocation2]   ;;  %s4077_s17 = smov [#allocation7]  }
  0x15   :  { %s22_s16 = sshll.u32 %s4076_s15, 4  ;;  %s45_s18 = sshll.u32 %s4077_s17, 4  ;;  %s23_s16 = int_to_ptr.vmem [resolvable:$true] %s22_s16  ;;  %s46_s18 = int_to_ptr.vmem [resolvable:$true] %s45_s18 }
  0x16   :  { %s3977_s21 = scalar_lea.hbm %s4241_s0, 448 }
  0x17   :  { %p3978_p8 = scmp.ne.s32.totalorder %s4241_s0, %s3977_s21  ;;  %p3981_p9 = scmp.lt.u32.totalorder %s3977_s21, %s4241_s0 }
  0x19   :  { %p3983_p10 = pnand %p3981_p9, %p3978_p8 }
  0x1b   :  { %3986 = shalt.err (!%p3983_p10)
}
  0x1c   :  { %s3987_s1 = scalar_lea.vmem %s23_s16, 448  ;;  %p3992_p12 = scmp.lt.s32.totalorder %s23_s16, %s23_s16 }
  0x1d   :  { %p3988_p11 = scmp.ne.s32.totalorder %s23_s16, %s3987_s1  ;;  %p3993_p13 = scmp.lt.s32.totalorder %s3987_s1, %s3987_s1 }
  0x1f   :  { %p3994_p0 = por %p3993_p13, %p3992_p12 }
  0x21   :  { %p3995_p1 = pnand %p3994_p0, %p3988_p11 }
  0x23   :  { %3998 = shalt.err (!%p3995_p1)
}
  0x24   :  { %25 = dma.hbm_to_vmem [thread:$0]  %s4241_s0, 448, %s23_s16, [#allocation3]  }
  0x25   :  { %s3999_s30 = scalar_lea.hbm %s4244_s3, 16384 }
  0x26   :  { %p4000_p2 = scmp.ne.s32.totalorder %s4244_s3, %s3999_s30  ;;  %p4003_p3 = scmp.lt.u32.totalorder %s3999_s30, %s4244_s3 }
  0x28   :  { %p4005_p4 = pnand %p4003_p3, %p4000_p2 }
  0x2a   :  { %4008 = shalt.err (!%p4005_p4)
}
  0x2b   :  { %s4009_s14 = scalar_lea.vmem %s46_s18, 16384  ;;  %p4014_p6 = scmp.lt.s32.totalorder %s46_s18, %s46_s18 }
  0x2c   :  { %p4010_p5 = scmp.ne.s32.totalorder %s46_s18, %s4009_s14  ;;  %p4015_p7 = scmp.lt.s32.totalorder %s4009_s14, %s4009_s14 }
  0x2e   :  { %p4016_p8 = por %p4015_p7, %p4014_p6 }
  0x30   :  { %p4017_p9 = pnand %p4016_p8, %p4010_p5 }
  0x32   :  { %4020 = shalt.err (!%p4017_p9)
}
  0x33   :  { %51 = dma.hbm_to_vmem [thread:$0]  %s4244_s3, 16384, %s46_s18, [#allocation6], %s4074_s11, %s4074_s11, %s4075_s12  }
  0x34   :  { %s4078_s16 = smov [#allocation8]   ;;  %s4021_s21 = scalar_lea.hbm %s4246_s5, 4096 }
  0x35   :  { %s59_s17 = sshll.u32 %s4078_s16, 4  ;;  %p4022_p10 = scmp.ne.s32.totalorder %s4246_s5, %s4021_s21  ;;  %s60_s17 = int_to_ptr.vmem [resolvable:$true] %s59_s17 }
  0x36   :  { %p4025_p11 = scmp.lt.u32.totalorder %s4021_s21, %s4246_s5 }
  0x38   :  { %p4027_p12 = pnand %p4025_p11, %p4022_p10 }
  0x3a   :  { %4030 = shalt.err (!%p4027_p12)
}
  0x3b   :  { %s4031_s1 = scalar_lea.vmem %s60_s17, 4096  ;;  %p4036_p0 = scmp.lt.s32.totalorder %s60_s17, %s60_s17 }
  0x3c   :  { %p4032_p13 = scmp.ne.s32.totalorder %s60_s17, %s4031_s1  ;;  %p4037_p1 = scmp.lt.s32.totalorder %s4031_s1, %s4031_s1 }
  0x3e   :  { %p4038_p2 = por %p4037_p1, %p4036_p0 }
  0x40   :  { %p4039_p3 = pnand %p4038_p2, %p4032_p13 }
  0x42   :  { %4042 = shalt.err (!%p4039_p3)
}
  0x43   :  { %s4079_s3 = smov 64   ;;  %s4080_s11 = smov 4  }
  0x44   :  { %65 = dma.hbm_to_vmem [thread:$0]  %s4246_s5, 4096, %s60_s17, [#allocation9], %s4079_s3, %s4079_s3, %s4080_s11  }
  0x45   :  { %4065 = dma.done.wait [#allocation3], 448  }
  0x46   :  { %4066 = vsyncadd [#allocation3], 4294966848 }
  0x47   :  { %4067 = dma.done.wait [#allocation6], 41472  }
  0x48   :  { %4068 = vsyncadd [#allocation6], 4294925824 }
  0x49   :  { %4069 = dma.done.wait [#allocation9], 4096  }
  0x4a   :  { %4070 = vsyncadd [#allocation9], 4294963200  ;;  %v3430_v0 = vld [vmem:[#allocation5 + $0x4] ss:$16 sps:$4 sm:$0xff]   ;;  %v3432_v1 = vld [vmem:[#allocation5 + $0xc] ss:$16 sps:$4 sm:$0xff]  }
  0x4b   :  { %1311 = vmatprep.subr.bf16.mxu0 %v3430_v0  ;;  %v3434_v2 = vld [vmem:[#allocation5] ss:$16 sps:$4 sm:$0xff]   ;;  %v3435_v3 = vld [vmem:[#allocation5 + $0x8] ss:$16 sps:$4 sm:$0xff]   ;;  %1475 = vmatprep.subr.bf16.mxu1 %v3432_v1  ;;  %v3436_v4 = vld [vmem:[#allocation5 + $0x24] ss:$16 sps:$4 sm:$0xff]  }
  0x4c   :  { %1312 = vmatpush1.bf16.msra.mxu0 %v3434_v2  ;;  %1476 = vmatpush1.bf16.msra.mxu1 %v3435_v3  ;;  %v3438_v5 = vld [vmem:[#allocation5 + $0x2c] ss:$16 sps:$4 sm:$0xff]   ;;  %v3440_v6 = vld [vmem:[#allocation5 + $0x20] ss:$16 sps:$4 sm:$0xff]   ;;  %v3441_v7 = vld [vmem:[#allocation5 + $0x28] ss:$16 sps:$4 sm:$0xff]  }
  0x4d   :  { %1313 = vmatprep.subr.bf16.mxu0 %v3436_v4  ;;  %1477 = vmatprep.subr.bf16.mxu1 %v3438_v5  ;;  %v3442_v8 = vld [vmem:[#allocation5 + $0x44] ss:$16 sps:$4 sm:$0xff]   ;;  %v3444_v9 = vld [vmem:[#allocation5 + $0x4c] ss:$16 sps:$4 sm:$0xff]   ;;  %v3446_v10 = vld [vmem:[#allocation5 + $0x40] ss:$16 sps:$4 sm:$0xff]  }
  0x4e   :  { %v3447_v11 = vld [vmem:[#allocation5 + $0x48] ss:$16 sps:$4 sm:$0xff]   ;;  %v3448_v12 = vld [vmem:[#allocation5 + $0x64] ss:$16 sps:$4 sm:$0xff]   ;;  %v3450_v13 = vld [vmem:[#allocation5 + $0x6c] ss:$16 sps:$4 sm:$0xff]  }
  0x4f   :  { %v3452_v14 = vld [vmem:[#allocation5 + $0x60] ss:$16 sps:$4 sm:$0xff]   ;;  %v3453_v15 = vld [vmem:[#allocation5 + $0x68] ss:$16 sps:$4 sm:$0xff]   ;;  %v3454_v16 = vld [vmem:[#allocation5 + $0x84] ss:$16 sps:$4 sm:$0xff]  }
  0x50   :  { %1314 = vmatpush1.bf16.msra.mxu0 %v3440_v6  ;;  %1478 = vmatpush1.bf16.msra.mxu1 %v3441_v7  ;;  %v3456_v17 = vld [vmem:[#allocation5 + $0x8c] ss:$16 sps:$4 sm:$0xff]   ;;  %v3458_v18 = vld [vmem:[#allocation5 + $0x80] ss:$16 sps:$4 sm:$0xff]   ;;  %v3459_v19 = vld [vmem:[#allocation5 + $0x88] ss:$16 sps:$4 sm:$0xff]  }
  0x51   :  { %1315 = vmatprep.subr.bf16.mxu0 %v3442_v8  ;;  %1479 = vmatprep.subr.bf16.mxu1 %v3444_v9  ;;  %v3460_v20 = vld [vmem:[#allocation5 + $0xa4] ss:$16 sps:$4 sm:$0xff]   ;;  %v3462_v21 = vld [vmem:[#allocation5 + $0xac] ss:$16 sps:$4 sm:$0xff]   ;;  %v3464_v22 = vld [vmem:[#allocation5 + $0xa0] ss:$16 sps:$4 sm:$0xff]  }
  0x52   :  { %v3465_v23 = vld [vmem:[#allocation5 + $0xa8] ss:$16 sps:$4 sm:$0xff]   ;;  %v3466_v24 = vld [vmem:[#allocation5 + $0xc4] ss:$16 sps:$4 sm:$0xff]   ;;  %v3468_v25 = vld [vmem:[#allocation5 + $0xcc] ss:$16 sps:$4 sm:$0xff]  }
  0x53   :  { %v3470_v26 = vld [vmem:[#allocation5 + $0xc0] ss:$16 sps:$4 sm:$0xff]   ;;  %v3471_v27 = vld [vmem:[#allocation5 + $0xc8] ss:$16 sps:$4 sm:$0xff]   ;;  %v3472_v28 = vld [vmem:[#allocation5 + $0xe4] ss:$16 sps:$4 sm:$0xff]  }
  0x54   :  { %1316 = vmatpush1.bf16.msra.mxu0 %v3446_v10  ;;  %1480 = vmatpush1.bf16.msra.mxu1 %v3447_v11  ;;  %v3474_v29 = vld [vmem:[#allocation5 + $0xec] ss:$16 sps:$4 sm:$0xff]   ;;  %v3476_v30 = vld [vmem:[#allocation5 + $0xe0] ss:$16 sps:$4 sm:$0xff]   ;;  %v3477_v31 = vld [vmem:[#allocation5 + $0xe8] ss:$16 sps:$4 sm:$0xff]  }
  0x55   :  { %1317 = vmatprep.subr.bf16.mxu0 %v3448_v12  ;;  %1481 = vmatprep.subr.bf16.mxu1 %v3450_v13  ;;  %v3478_v32 = vld [vmem:[#allocation5 + $0x104] ss:$16 sps:$4 sm:$0xff]   ;;  %v3480_v33 = vld [vmem:[#allocation5 + $0x10c] ss:$16 sps:$4 sm:$0xff]   ;;  %v3482_v34 = vld [vmem:[#allocation5 + $0x100] ss:$16 sps:$4 sm:$0xff]  }
  0x56   :  { %v3483_v35 = vld [vmem:[#allocation5 + $0x108] ss:$16 sps:$4 sm:$0xff]   ;;  %v3484_v36 = vld [vmem:[#allocation5 + $0x124] ss:$16 sps:$4 sm:$0xff]   ;;  %v3486_v37 = vld [vmem:[#allocation5 + $0x12c] ss:$16 sps:$4 sm:$0xff]  }
  0x57   :  { %v3488_v38 = vld [vmem:[#allocation5 + $0x120] ss:$16 sps:$4 sm:$0xff]   ;;  %v3489_v39 = vld [vmem:[#allocation5 + $0x128] ss:$16 sps:$4 sm:$0xff]   ;;  %v3490_v40 = vld [vmem:[#allocation5 + $0x144] ss:$16 sps:$4 sm:$0xff]  }
  0x58   :  { %1318 = vmatpush1.bf16.msra.mxu0 %v3452_v14  ;;  %1482 = vmatpush1.bf16.msra.mxu1 %v3453_v15  ;;  %v3492_v41 = vld [vmem:[#allocation5 + $0x14c] ss:$16 sps:$4 sm:$0xff]   ;;  %v3494_v42 = vld [vmem:[#allocation5 + $0x140] ss:$16 sps:$4 sm:$0xff]   ;;  %v3495_v43 = vld [vmem:[#allocation5 + $0x148] ss:$16 sps:$4 sm:$0xff]  }
  0x59   :  { %1319 = vmatprep.subr.bf16.mxu0 %v3454_v16  ;;  %1483 = vmatprep.subr.bf16.mxu1 %v3456_v17  ;;  %v3496_v44 = vld [vmem:[#allocation5 + $0x164] ss:$16 sps:$4 sm:$0xff]   ;;  %v3498_v45 = vld [vmem:[#allocation5 + $0x16c] ss:$16 sps:$4 sm:$0xff]   ;;  %v3500_v47 = vld [vmem:[#allocation5 + $0x160] ss:$16 sps:$4 sm:$0xff]  }
  0x5a   :  { %v81_v46 = vld [vmem:[#allocation2] sm:$0xff]  ;;  %v3504_v51 = vld [vmem:[#allocation5 + $0x18c] ss:$16 sps:$4 sm:$0xff]   ;;  %v3506_v52 = vld [vmem:[#allocation5 + $0x180] ss:$16 sps:$4 sm:$0xff]   ;;  %vm1307_vm0 = vcmask 130048  }
  0x5b   :  { %v2971_v48 = vcombine.high %v81_v46, %v81_v46  ;;  %v3501_v49 = vld [vmem:[#allocation5 + $0x168] ss:$16 sps:$4 sm:$0xff]   ;;  %v3502_v50 = vld [vmem:[#allocation5 + $0x184] ss:$16 sps:$4 sm:$0xff]   ;;  %v3510_v55 = vld [vmem:[#allocation5 + $0x1ac] ss:$16 sps:$4 sm:$0xff]   ;;  %v2970_v4 = vcombine.low %v81_v46, %v81_v46 }
  0x5c   :  { %1320 = vmatpush1.bf16.msra.mxu0 %v3458_v18  ;;  %1484 = vmatpush1.bf16.msra.mxu1 %v3459_v19  ;;  %v3507_v53 = vld [vmem:[#allocation5 + $0x188] ss:$16 sps:$4 sm:$0xff]   ;;  %v3508_v54 = vld [vmem:[#allocation5 + $0x1a4] ss:$16 sps:$4 sm:$0xff]   ;;  %v3512_v56 = vld [vmem:[#allocation5 + $0x1a0] ss:$16 sps:$4 sm:$0xff]  }
  0x5d   :  { %1321 = vmatprep.subr.bf16.mxu0 %v3460_v20  ;;  %1485 = vmatprep.subr.bf16.mxu1 %v3462_v21  ;;  %v3513_v57 = vld [vmem:[#allocation5 + $0x1a8] ss:$16 sps:$4 sm:$0xff]   ;;  %v3514_v58 = vld [vmem:[#allocation5 + $0x1c4] ss:$16 sps:$4 sm:$0xff]   ;;  %v3516_v59 = vld [vmem:[#allocation5 + $0x1cc] ss:$16 sps:$4 sm:$0xff]  }
  0x5e   :  { %1343 = vmatprep.mubr.bf16.mxu0 %v2971_v48  ;;  %1507 = vmatprep.mubr.bf16.mxu1 %v2971_v48  ;;  %v3518_v60 = vld [vmem:[#allocation5 + $0x1c0] ss:$16 sps:$4 sm:$0xff]   ;;  %v3519_v61 = vld [vmem:[#allocation5 + $0x1c8] ss:$16 sps:$4 sm:$0xff]   ;;  %v3520_v62 = vld [vmem:[#allocation5 + $0x1e4] ss:$16 sps:$4 sm:$0xff]  }
  0x5f   :  { %v3522_v63 = vld [vmem:[#allocation5 + $0x1ec] ss:$16 sps:$4 sm:$0xff]   ;;  %v3524_v0 = vld [vmem:[#allocation5 + $0x1e0] ss:$16 sps:$4 sm:$0xff]   ;;  %v3525_v1 = vld [vmem:[#allocation5 + $0x1e8] ss:$16 sps:$4 sm:$0xff]  }
  0x60   :  { %1322 = vmatpush1.bf16.msra.mxu0 %v3464_v22  ;;  %1486 = vmatpush1.bf16.msra.mxu1 %v3465_v23  ;;  %v3530_v2 = vld [vmem:[#allocation5 + $0x204] ss:$16 sps:$4 sm:$0xff]   ;;  %v3533_v3 = vld [vmem:[#allocation5 + $0x20c] ss:$16 sps:$4 sm:$0xff]   ;;  %v3528_v5 = vld [vmem:[#allocation5 + $0x200] ss:$16 sps:$4 sm:$0xff]  }
  0x61   :  { %1323 = vmatprep.subr.bf16.mxu0 %v3466_v24  ;;  %1487 = vmatprep.subr.bf16.mxu1 %v3468_v25  ;;  %v3531_v6 = vld [vmem:[#allocation5 + $0x208] ss:$16 sps:$4 sm:$0xff]   ;;  %v3536_v7 = vld [vmem:[#allocation5 + $0x224] ss:$16 sps:$4 sm:$0xff]   ;;  %v3539_v8 = vld [vmem:[#allocation5 + $0x22c] ss:$16 sps:$4 sm:$0xff]  }
  0x62   :  { %v3534_v9 = vld [vmem:[#allocation5 + $0x220] ss:$16 sps:$4 sm:$0xff]   ;;  %v3537_v10 = vld [vmem:[#allocation5 + $0x228] ss:$16 sps:$4 sm:$0xff]   ;;  %v3542_v11 = vld [vmem:[#allocation5 + $0x244] ss:$16 sps:$4 sm:$0xff]  }
  0x63   :  { %v3545_v12 = vld [vmem:[#allocation5 + $0x24c] ss:$16 sps:$4 sm:$0xff]   ;;  %v3540_v13 = vld [vmem:[#allocation5 + $0x240] ss:$16 sps:$4 sm:$0xff]   ;;  %v3543_v14 = vld [vmem:[#allocation5 + $0x248] ss:$16 sps:$4 sm:$0xff]  }
  0x64   :  { %1324 = vmatpush1.bf16.msra.mxu0 %v3470_v26  ;;  %1488 = vmatpush1.bf16.msra.mxu1 %v3471_v27  ;;  %v3548_v15 = vld [vmem:[#allocation5 + $0x264] ss:$16 sps:$4 sm:$0xff]   ;;  %v3551_v16 = vld [vmem:[#allocation5 + $0x26c] ss:$16 sps:$4 sm:$0xff]   ;;  %v3546_v17 = vld [vmem:[#allocation5 + $0x260] ss:$16 sps:$4 sm:$0xff]  }
  0x65   :  { %1325 = vmatprep.subr.bf16.mxu0 %v3472_v28  ;;  %1489 = vmatprep.subr.bf16.mxu1 %v3474_v29  ;;  %v3549_v18 = vld [vmem:[#allocation5 + $0x268] ss:$16 sps:$4 sm:$0xff]   ;;  %v3554_v19 = vld [vmem:[#allocation5 + $0x284] ss:$16 sps:$4 sm:$0xff]   ;;  %v3557_v20 = vld [vmem:[#allocation5 + $0x28c] ss:$16 sps:$4 sm:$0xff]  }
  0x66   :  { %v3552_v21 = vld [vmem:[#allocation5 + $0x280] ss:$16 sps:$4 sm:$0xff]   ;;  %v3555_v22 = vld [vmem:[#allocation5 + $0x288] ss:$16 sps:$4 sm:$0xff]   ;;  %v3560_v23 = vld [vmem:[#allocation5 + $0x2a4] ss:$16 sps:$4 sm:$0xff]  }
  0x67   :  { %v3563_v24 = vld [vmem:[#allocation5 + $0x2ac] ss:$16 sps:$4 sm:$0xff]   ;;  %v3558_v25 = vld [vmem:[#allocation5 + $0x2a0] ss:$16 sps:$4 sm:$0xff]   ;;  %v3561_v26 = vld [vmem:[#allocation5 + $0x2a8] ss:$16 sps:$4 sm:$0xff]  }
  0x68   :  { %1326 = vmatpush1.bf16.msra.mxu0 %v3476_v30  ;;  %1490 = vmatpush1.bf16.msra.mxu1 %v3477_v31  ;;  %v3566_v27 = vld [vmem:[#allocation5 + $0x2c4] ss:$16 sps:$4 sm:$0xff]   ;;  %v3569_v28 = vld [vmem:[#allocation5 + $0x2cc] ss:$16 sps:$4 sm:$0xff]   ;;  %v3564_v31 = vld [vmem:[#allocation5 + $0x2c0] ss:$16 sps:$4 sm:$0xff]  }
  0x69   :  { %1327 = vmatprep.subr.bf16.mxu0 %v3478_v32  ;;  %1491 = vmatprep.subr.bf16.mxu1 %v3480_v33  ;;  %v4177_v29 = vld [vmem:[#allocation2 + $0x8] sm:$0xff]  ;;  %v3567_v32 = vld [vmem:[#allocation5 + $0x2c8] ss:$16 sps:$4 sm:$0xff]   ;;  %v3572_v33 = vld [vmem:[#allocation5 + $0x2e4] ss:$16 sps:$4 sm:$0xff]   ;;  %s4082_s29 = smov [#allocation10]  }
  0x6a   :  { %v2973_v30 = vcombine.high %v4177_v29, %v4177_v29  ;;  %v3593_v46 = vld [vmem:[#allocation5 + $0x34c] ss:$16 sps:$4 sm:$0xff]   ;;  %v3591_v48 = vld [vmem:[#allocation5 + $0x348] ss:$16 sps:$4 sm:$0xff]   ;;  %s2959_s30 = sshll.u32 %s4082_s29, 4  ;;  %s2960_s30 = int_to_ptr.vmem [resolvable:$true] %s2959_s30 }
  0x6b   :  { %s4043_s8 = scalar_lea.vmem %s2960_s30, 128  ;;  %p4048_p5 = scmp.lt.s32.totalorder %s2960_s30, %s2960_s30 }
  0x6c   :  { %1328 = vmatpush1.bf16.msra.mxu0 %v3482_v34  ;;  %1492 = vmatpush1.bf16.msra.mxu1 %v3483_v35  ;;  %v3575_v34 = vld [vmem:[#allocation5 + $0x2ec] ss:$16 sps:$4 sm:$0xff]   ;;  %v3570_v35 = vld [vmem:[#allocation5 + $0x2e0] ss:$16 sps:$4 sm:$0xff]   ;;  %p4044_p4 = scmp.ne.s32.totalorder %s2960_s30, %s4043_s8  ;;  %p4049_p6 = scmp.lt.s32.totalorder %s4043_s8, %s4043_s8 }
  0x6d   :  { %1329 = vmatprep.subr.bf16.mxu0 %v3484_v36  ;;  %1493 = vmatprep.subr.bf16.mxu1 %v3486_v37  ;;  %v3573_v36 = vld [vmem:[#allocation5 + $0x2e8] ss:$16 sps:$4 sm:$0xff]   ;;  %v3578_v37 = vld [vmem:[#allocation5 + $0x304] ss:$16 sps:$4 sm:$0xff]  }
  0x6e   :  { %p4050_p7 = por %p4049_p6, %p4048_p5 }
  0x70   :  { %1330 = vmatpush1.bf16.msra.mxu0 %v3488_v38  ;;  %1494 = vmatpush1.bf16.msra.mxu1 %v3489_v39  ;;  %v3581_v38 = vld [vmem:[#allocation5 + $0x30c] ss:$16 sps:$4 sm:$0xff]   ;;  %v3576_v39 = vld [vmem:[#allocation5 + $0x300] ss:$16 sps:$4 sm:$0xff]   ;;  %p4051_p8 = pnand %p4050_p7, %p4044_p4 }
  0x71   :  { %1331 = vmatprep.subr.bf16.mxu0 %v3490_v40  ;;  %1495 = vmatprep.subr.bf16.mxu1 %v3492_v41  ;;  %v3579_v40 = vld [vmem:[#allocation5 + $0x308] ss:$16 sps:$4 sm:$0xff]   ;;  %v3584_v41 = vld [vmem:[#allocation5 + $0x324] ss:$16 sps:$4 sm:$0xff]  }
  0x74   :  { %1332 = vmatpush1.bf16.msra.mxu0 %v3494_v42  ;;  %1496 = vmatpush1.bf16.msra.mxu1 %v3495_v43  ;;  %v3587_v42 = vld [vmem:[#allocation5 + $0x32c] ss:$16 sps:$4 sm:$0xff]   ;;  %v3582_v43 = vld [vmem:[#allocation5 + $0x320] ss:$16 sps:$4 sm:$0xff]  }
  0x75   :  { %1333 = vmatprep.subr.bf16.mxu0 %v3496_v44  ;;  %1497 = vmatprep.subr.bf16.mxu1 %v3498_v45  ;;  %v3585_v44 = vld [vmem:[#allocation5 + $0x328] ss:$16 sps:$4 sm:$0xff]   ;;  %v3590_v45 = vld [vmem:[#allocation5 + $0x344] ss:$16 sps:$4 sm:$0xff]  }
  0x78   :  { %1334 = vmatpush1.bf16.msra.mxu0 %v3500_v47  ;;  %1498 = vmatpush1.bf16.msra.mxu1 %v3501_v49  ;;  %v3588_v47 = vld [vmem:[#allocation5 + $0x340] ss:$16 sps:$4 sm:$0xff]   ;;  %v3596_v49 = vld [vmem:[#allocation5 + $0x364] ss:$16 sps:$4 sm:$0xff]  }
  0x79   :  { %1335 = vmatprep.subr.bf16.mxu0 %v3502_v50  ;;  %1499 = vmatprep.subr.bf16.mxu1 %v3504_v51  ;;  %v3599_v50 = vld [vmem:[#allocation5 + $0x36c] ss:$16 sps:$4 sm:$0xff]   ;;  %v3594_v51 = vld [vmem:[#allocation5 + $0x360] ss:$16 sps:$4 sm:$0xff]  }
  0x7c   :  { %1336 = vmatpush1.bf16.msra.mxu0 %v3506_v52  ;;  %1500 = vmatpush1.bf16.msra.mxu1 %v3507_v53  ;;  %v3597_v52 = vld [vmem:[#allocation5 + $0x368] ss:$16 sps:$4 sm:$0xff]   ;;  %v3602_v53 = vld [vmem:[#allocation5 + $0x384] ss:$16 sps:$4 sm:$0xff]  }
  0x7d   :  { %1337 = vmatprep.subr.bf16.mxu0 %v3508_v54  ;;  %1501 = vmatprep.subr.bf16.mxu1 %v3510_v55  ;;  %v3605_v54 = vld [vmem:[#allocation5 + $0x38c] ss:$16 sps:$4 sm:$0xff]   ;;  %v3600_v55 = vld [vmem:[#allocation5 + $0x380] ss:$16 sps:$4 sm:$0xff]  }
  0x80   :  { %1338 = vmatpush1.bf16.msra.mxu0 %v3512_v56  ;;  %1502 = vmatpush1.bf16.msra.mxu1 %v3513_v57  ;;  %v3603_v56 = vld [vmem:[#allocation5 + $0x388] ss:$16 sps:$4 sm:$0xff]   ;;  %v3608_v57 = vld [vmem:[#allocation5 + $0x3a4] ss:$16 sps:$4 sm:$0xff]  }
  0x81   :  { %1339 = vmatprep.subr.bf16.mxu0 %v3514_v58  ;;  %1503 = vmatprep.subr.bf16.mxu1 %v3516_v59  ;;  %v3611_v58 = vld [vmem:[#allocation5 + $0x3ac] ss:$16 sps:$4 sm:$0xff]   ;;  %v3606_v59 = vld [vmem:[#allocation5 + $0x3a0] ss:$16 sps:$4 sm:$0xff]  }
  0x84   :  { %1340 = vmatpush1.bf16.msra.mxu0 %v3518_v60  ;;  %1504 = vmatpush1.bf16.msra.mxu1 %v3519_v61  ;;  %v3609_v60 = vld [vmem:[#allocation5 + $0x3a8] ss:$16 sps:$4 sm:$0xff]   ;;  %v3614_v61 = vld [vmem:[#allocation5 + $0x3c4] ss:$16 sps:$4 sm:$0xff]  }
  0x85   :  { %1341 = vmatprep.subr.bf16.mxu0 %v3520_v62  ;;  %1505 = vmatprep.subr.bf16.mxu1 %v3522_v63  ;;  %v3617_v62 = vld [vmem:[#allocation5 + $0x3cc] ss:$16 sps:$4 sm:$0xff]   ;;  %v3612_v63 = vld [vmem:[#allocation5 + $0x3c0] ss:$16 sps:$4 sm:$0xff]  }
  0x88   :  { %1342 = vmatpush1.bf16.msra.mxu0 %v3524_v0  ;;  %1506 = vmatpush1.bf16.msra.mxu1 %v3525_v1  ;;  %v3615_v0 = vld [vmem:[#allocation5 + $0x3c8] ss:$16 sps:$4 sm:$0xff]   ;;  %v3620_v1 = vld [vmem:[#allocation5 + $0x3e4] ss:$16 sps:$4 sm:$0xff]  }
  0x89   :  { %1352 = vmatprep.subr.bf16.mxu0 %v3530_v2  ;;  %1516 = vmatprep.subr.bf16.mxu1 %v3533_v3  ;;  %v3623_v2 = vld [vmem:[#allocation5 + $0x3ec] ss:$16 sps:$4 sm:$0xff]   ;;  %v3618_v3 = vld [vmem:[#allocation5 + $0x3e0] ss:$16 sps:$4 sm:$0xff]  }
  0x8b   :  { %1344 = vmatmul.mubr.bf16.vlgmr.msra.gmra.mrb[0].mxu0 %v2970_v4  ;;  %1508 = vmatmul.mubr.bf16.vlgmr.msra.gmra.mrb[0].mxu1 %v2970_v4  ;;  %v3621_v4 = vld [vmem:[#allocation5 + $0x3e8] ss:$16 sps:$4 sm:$0xff]  }
  0x8c   :  { %1353 = vmatpush1.bf16.msra.mxu0 %v3528_v5  ;;  %1517 = vmatpush1.bf16.msra.mxu1 %v3531_v6  ;;  %v3628_v5 = vld [vmem:[#allocation5 + $0x404] ss:$16 sps:$4 sm:$0xff]   ;;  %v3631_v6 = vld [vmem:[#allocation5 + $0x40c] ss:$16 sps:$4 sm:$0xff]  }
  0x8d   :  { %1354 = vmatprep.subr.bf16.mxu0 %v3536_v7  ;;  %1518 = vmatprep.subr.bf16.mxu1 %v3539_v8  ;;  %v2972_v7 = vcombine.low %v4177_v29, %v4177_v29  ;;  %v3626_v8 = vld [vmem:[#allocation5 + $0x400] ss:$16 sps:$4 sm:$0xff]   ;;  %v3661_v29 = vld [vmem:[#allocation5 + $0x4ac] ss:$16 sps:$4 sm:$0xff]  }
  0x8e   :  { %1384 = vmatprep.mubr.bf16.mxu0 %v2973_v30  ;;  %1548 = vmatprep.mubr.bf16.mxu1 %v2973_v30  ;;  %v3656_v30 = vld [vmem:[#allocation5 + $0x4a0] ss:$16 sps:$4 sm:$0xff]  }
  0x90   :  { %1355 = vmatpush1.bf16.msra.mxu0 %v3534_v9  ;;  %1519 = vmatpush1.bf16.msra.mxu1 %v3537_v10  ;;  %v3629_v9 = vld [vmem:[#allocation5 + $0x408] ss:$16 sps:$4 sm:$0xff]   ;;  %v3634_v10 = vld [vmem:[#allocation5 + $0x424] ss:$16 sps:$4 sm:$0xff]  }
  0x91   :  { %1356 = vmatprep.subr.bf16.mxu0 %v3542_v11  ;;  %1520 = vmatprep.subr.bf16.mxu1 %v3545_v12  ;;  %v4183_v11 = vld [vmem:[#allocation2 + $0x10] sm:$0xff]  ;;  %v3637_v12 = vld [vmem:[#allocation5 + $0x42c] ss:$16 sps:$4 sm:$0xff]  }
  0x94   :  { %1357 = vmatpush1.bf16.msra.mxu0 %v3540_v13  ;;  %1521 = vmatpush1.bf16.msra.mxu1 %v3543_v14  ;;  %v2975_v13 = vcombine.high %v4183_v11, %v4183_v11  ;;  %v3632_v14 = vld [vmem:[#allocation5 + $0x420] ss:$16 sps:$4 sm:$0xff]  }
  0x95   :  { %1358 = vmatprep.subr.bf16.mxu0 %v3548_v15  ;;  %1522 = vmatprep.subr.bf16.mxu1 %v3551_v16  ;;  %v3635_v15 = vld [vmem:[#allocation5 + $0x428] ss:$16 sps:$4 sm:$0xff]   ;;  %v3640_v16 = vld [vmem:[#allocation5 + $0x444] ss:$16 sps:$4 sm:$0xff]  }
  0x98   :  { %1359 = vmatpush1.bf16.msra.mxu0 %v3546_v17  ;;  %1523 = vmatpush1.bf16.msra.mxu1 %v3549_v18  ;;  %v3643_v17 = vld [vmem:[#allocation5 + $0x44c] ss:$16 sps:$4 sm:$0xff]   ;;  %v3638_v18 = vld [vmem:[#allocation5 + $0x440] ss:$16 sps:$4 sm:$0xff]  }
  0x99   :  { %1360 = vmatprep.subr.bf16.mxu0 %v3554_v19  ;;  %1524 = vmatprep.subr.bf16.mxu1 %v3557_v20  ;;  %v3641_v19 = vld [vmem:[#allocation5 + $0x448] ss:$16 sps:$4 sm:$0xff]   ;;  %v3646_v20 = vld [vmem:[#allocation5 + $0x464] ss:$16 sps:$4 sm:$0xff]  }
  0x9c   :  { %1361 = vmatpush1.bf16.msra.mxu0 %v3552_v21  ;;  %1525 = vmatpush1.bf16.msra.mxu1 %v3555_v22  ;;  %v3649_v21 = vld [vmem:[#allocation5 + $0x46c] ss:$16 sps:$4 sm:$0xff]   ;;  %v3644_v22 = vld [vmem:[#allocation5 + $0x460] ss:$16 sps:$4 sm:$0xff]  }
  0x9d   :  { %1362 = vmatprep.subr.bf16.mxu0 %v3560_v23  ;;  %1526 = vmatprep.subr.bf16.mxu1 %v3563_v24  ;;  %v3647_v23 = vld [vmem:[#allocation5 + $0x468] ss:$16 sps:$4 sm:$0xff]   ;;  %v3652_v24 = vld [vmem:[#allocation5 + $0x484] ss:$16 sps:$4 sm:$0xff]  }
  0xa0   :  { %1363 = vmatpush1.bf16.msra.mxu0 %v3558_v25  ;;  %1527 = vmatpush1.bf16.msra.mxu1 %v3561_v26  ;;  %v3655_v25 = vld [vmem:[#allocation5 + $0x48c] ss:$16 sps:$4 sm:$0xff]   ;;  %v3650_v26 = vld [vmem:[#allocation5 + $0x480] ss:$16 sps:$4 sm:$0xff]  }
  0xa1   :  { %1364 = vmatprep.subr.bf16.mxu0 %v3566_v27  ;;  %1528 = vmatprep.subr.bf16.mxu1 %v3569_v28  ;;  %v3653_v27 = vld [vmem:[#allocation5 + $0x488] ss:$16 sps:$4 sm:$0xff]   ;;  %v3658_v28 = vld [vmem:[#allocation5 + $0x4a4] ss:$16 sps:$4 sm:$0xff]  }
  0xa4   :  { %1365 = vmatpush1.bf16.msra.mxu0 %v3564_v31  ;;  %1529 = vmatpush1.bf16.msra.mxu1 %v3567_v32  ;;  %v3659_v31 = vld [vmem:[#allocation5 + $0x4a8] ss:$16 sps:$4 sm:$0xff]   ;;  %v3664_v32 = vld [vmem:[#allocation5 + $0x4c4] ss:$16 sps:$4 sm:$0xff]  }
  0xa5   :  { %1366 = vmatprep.subr.bf16.mxu0 %v3572_v33  ;;  %1530 = vmatprep.subr.bf16.mxu1 %v3575_v34  ;;  %v3667_v33 = vld [vmem:[#allocation5 + $0x4cc] ss:$16 sps:$4 sm:$0xff]   ;;  %v3662_v34 = vld [vmem:[#allocation5 + $0x4c0] ss:$16 sps:$4 sm:$0xff]  }
  0xa8   :  { %1367 = vmatpush1.bf16.msra.mxu0 %v3570_v35  ;;  %1531 = vmatpush1.bf16.msra.mxu1 %v3573_v36  ;;  %v3665_v35 = vld [vmem:[#allocation5 + $0x4c8] ss:$16 sps:$4 sm:$0xff]   ;;  %v3670_v36 = vld [vmem:[#allocation5 + $0x4e4] ss:$16 sps:$4 sm:$0xff]  }
  0xa9   :  { %1368 = vmatprep.subr.bf16.mxu0 %v3578_v37  ;;  %1532 = vmatprep.subr.bf16.mxu1 %v3581_v38  ;;  %v3673_v37 = vld [vmem:[#allocation5 + $0x4ec] ss:$16 sps:$4 sm:$0xff]   ;;  %v3668_v38 = vld [vmem:[#allocation5 + $0x4e0] ss:$16 sps:$4 sm:$0xff]  }
  0xac   :  { %1369 = vmatpush1.bf16.msra.mxu0 %v3576_v39  ;;  %1533 = vmatpush1.bf16.msra.mxu1 %v3579_v40  ;;  %v3671_v39 = vld [vmem:[#allocation5 + $0x4e8] ss:$16 sps:$4 sm:$0xff]   ;;  %v3676_v40 = vld [vmem:[#allocation5 + $0x504] ss:$16 sps:$4 sm:$0xff]  }
  0xad   :  { %1370 = vmatprep.subr.bf16.mxu0 %v3584_v41  ;;  %1534 = vmatprep.subr.bf16.mxu1 %v3587_v42  ;;  %v3679_v41 = vld [vmem:[#allocation5 + $0x50c] ss:$16 sps:$4 sm:$0xff]   ;;  %v3674_v42 = vld [vmem:[#allocation5 + $0x500] ss:$16 sps:$4 sm:$0xff]  }
  0xb0   :  { %1371 = vmatpush1.bf16.msra.mxu0 %v3582_v43  ;;  %1535 = vmatpush1.bf16.msra.mxu1 %v3585_v44  ;;  %v3677_v43 = vld [vmem:[#allocation5 + $0x508] ss:$16 sps:$4 sm:$0xff]   ;;  %v3682_v44 = vld [vmem:[#allocation5 + $0x524] ss:$16 sps:$4 sm:$0xff]  }
  0xb1   :  { %1372 = vmatprep.subr.bf16.mxu0 %v3590_v45  ;;  %1536 = vmatprep.subr.bf16.mxu1 %v3593_v46  ;;  %v3685_v45 = vld [vmem:[#allocation5 + $0x52c] ss:$16 sps:$4 sm:$0xff]   ;;  %v3680_v46 = vld [vmem:[#allocation5 + $0x520] ss:$16 sps:$4 sm:$0xff]  }
  0xb4   :  { %1373 = vmatpush1.bf16.msra.mxu0 %v3588_v47  ;;  %1537 = vmatpush1.bf16.msra.mxu1 %v3591_v48  ;;  %v3683_v47 = vld [vmem:[#allocation5 + $0x528] ss:$16 sps:$4 sm:$0xff]   ;;  %v3688_v48 = vld [vmem:[#allocation5 + $0x544] ss:$16 sps:$4 sm:$0xff]  }
  0xb5   :  { %1374 = vmatprep.subr.bf16.mxu0 %v3596_v49  ;;  %1538 = vmatprep.subr.bf16.mxu1 %v3599_v50  ;;  %v3691_v49 = vld [vmem:[#allocation5 + $0x54c] ss:$16 sps:$4 sm:$0xff]   ;;  %v3686_v50 = vld [vmem:[#allocation5 + $0x540] ss:$16 sps:$4 sm:$0xff]  }
  0xb8   :  { %1375 = vmatpush1.bf16.msra.mxu0 %v3594_v51  ;;  %1539 = vmatpush1.bf16.msra.mxu1 %v3597_v52  ;;  %v3689_v51 = vld [vmem:[#allocation5 + $0x548] ss:$16 sps:$4 sm:$0xff]   ;;  %v3694_v52 = vld [vmem:[#allocation5 + $0x564] ss:$16 sps:$4 sm:$0xff]  }
  0xb9   :  { %1376 = vmatprep.subr.bf16.mxu0 %v3602_v53  ;;  %1540 = vmatprep.subr.bf16.mxu1 %v3605_v54  ;;  %v3697_v53 = vld [vmem:[#allocation5 + $0x56c] ss:$16 sps:$4 sm:$0xff]   ;;  %v3692_v54 = vld [vmem:[#allocation5 + $0x560] ss:$16 sps:$4 sm:$0xff]  }
  0xbc   :  { %1377 = vmatpush1.bf16.msra.mxu0 %v3600_v55  ;;  %1541 = vmatpush1.bf16.msra.mxu1 %v3603_v56  ;;  %v3695_v55 = vld [vmem:[#allocation5 + $0x568] ss:$16 sps:$4 sm:$0xff]   ;;  %v3700_v56 = vld [vmem:[#allocation5 + $0x584] ss:$16 sps:$4 sm:$0xff]  }
  0xbd   :  { %1378 = vmatprep.subr.bf16.mxu0 %v3608_v57  ;;  %1542 = vmatprep.subr.bf16.mxu1 %v3611_v58  ;;  %v3703_v57 = vld [vmem:[#allocation5 + $0x58c] ss:$16 sps:$4 sm:$0xff]   ;;  %v3698_v58 = vld [vmem:[#allocation5 + $0x580] ss:$16 sps:$4 sm:$0xff]  }
  0xc0   :  { %1379 = vmatpush1.bf16.msra.mxu0 %v3606_v59  ;;  %1543 = vmatpush1.bf16.msra.mxu1 %v3609_v60  ;;  %v3701_v59 = vld [vmem:[#allocation5 + $0x588] ss:$16 sps:$4 sm:$0xff]   ;;  %v3706_v60 = vld [vmem:[#allocation5 + $0x5a4] ss:$16 sps:$4 sm:$0xff]  }
  0xc1   :  { %1380 = vmatprep.subr.bf16.mxu0 %v3614_v61  ;;  %1544 = vmatprep.subr.bf16.mxu1 %v3617_v62  ;;  %v3709_v61 = vld [vmem:[#allocation5 + $0x5ac] ss:$16 sps:$4 sm:$0xff]   ;;  %v3704_v62 = vld [vmem:[#allocation5 + $0x5a0] ss:$16 sps:$4 sm:$0xff]  }
  0xc4   :  { %1381 = vmatpush1.bf16.msra.mxu0 %v3612_v63  ;;  %1545 = vmatpush1.bf16.msra.mxu1 %v3615_v0  ;;  %v3707_v63 = vld [vmem:[#allocation5 + $0x5a8] ss:$16 sps:$4 sm:$0xff]   ;;  %v3712_v0 = vld [vmem:[#allocation5 + $0x5c4] ss:$16 sps:$4 sm:$0xff]  }
  0xc5   :  { %1382 = vmatprep.subr.bf16.mxu0 %v3620_v1  ;;  %1546 = vmatprep.subr.bf16.mxu1 %v3623_v2  ;;  %v3715_v1 = vld [vmem:[#allocation5 + $0x5cc] ss:$16 sps:$4 sm:$0xff]   ;;  %v3710_v2 = vld [vmem:[#allocation5 + $0x5c0] ss:$16 sps:$4 sm:$0xff]  }
  0xc8   :  { %1383 = vmatpush1.bf16.msra.mxu0 %v3618_v3  ;;  %1547 = vmatpush1.bf16.msra.mxu1 %v3621_v4  ;;  %v3713_v3 = vld [vmem:[#allocation5 + $0x5c8] ss:$16 sps:$4 sm:$0xff]   ;;  %v3718_v4 = vld [vmem:[#allocation5 + $0x5e4] ss:$16 sps:$4 sm:$0xff]  }
  0xc9   :  { %1393 = vmatprep.subr.bf16.mxu0 %v3628_v5  ;;  %1557 = vmatprep.subr.bf16.mxu1 %v3631_v6  ;;  %v3721_v5 = vld [vmem:[#allocation5 + $0x5ec] ss:$16 sps:$4 sm:$0xff]   ;;  %v3716_v6 = vld [vmem:[#allocation5 + $0x5e0] ss:$16 sps:$4 sm:$0xff]  }
  0xcb   :  { %1385 = vmatmul.mubr.bf16.vlgmr.msra.gmra.mrb[0].mxu0 %v2972_v7  ;;  %1549 = vmatmul.mubr.bf16.vlgmr.msra.gmra.mrb[0].mxu1 %v2972_v7  ;;  %v3719_v7 = vld [vmem:[#allocation5 + $0x5e8] ss:$16 sps:$4 sm:$0xff]  }
  0xcc   :  { %1394 = vmatpush1.bf16.msra.mxu0 %v3626_v8  ;;  %1558 = vmatpush1.bf16.msra.mxu1 %v3629_v9  ;;  %v3726_v8 = vld [vmem:[#allocation5 + $0x604] ss:$16 sps:$4 sm:$0xff]   ;;  %v3729_v9 = vld [vmem:[#allocation5 + $0x60c] ss:$16 sps:$4 sm:$0xff]  }
  0xcd   :  { %1395 = vmatprep.subr.bf16.mxu0 %v3634_v10  ;;  %1559 = vmatprep.subr.bf16.mxu1 %v3637_v12  ;;  %v3724_v10 = vld [vmem:[#allocation5 + $0x600] ss:$16 sps:$4 sm:$0xff]   ;;  %v3727_v12 = vld [vmem:[#allocation5 + $0x608] ss:$16 sps:$4 sm:$0xff]  }
  0xce   :  { %1425 = vmatprep.mubr.bf16.mxu0 %v2975_v13  ;;  %1589 = vmatprep.mubr.bf16.mxu1 %v2975_v13  ;;  %v2974_v13 = vcombine.low %v4183_v11, %v4183_v11  ;;  %v3739_v11 = vld [vmem:[#allocation7 + $0x24] ss:$16 sps:$4 sm:$0xff]  }
  0xd0   :  { %1396 = vmatpush1.bf16.msra.mxu0 %v3632_v14  ;;  %1560 = vmatpush1.bf16.msra.mxu1 %v3635_v15  ;;  %v3733_v14 = vld [vmem:[#allocation7 + $0x4] ss:$16 sps:$4 sm:$0xff]   ;;  %v3736_v15 = vld [vmem:[#allocation7 + $0xc] ss:$16 sps:$4 sm:$0xff]  }
  0xd1   :  { %1397 = vmatprep.subr.bf16.mxu0 %v3640_v16  ;;  %1561 = vmatprep.subr.bf16.mxu1 %v3643_v17  ;;  %v4081_v16 = vmov 0   ;;  %v3730_v17 = vld [vmem:[#allocation2 + $0x18] ss:$0 sps:$4 sm:$0xff]  }
  0xd4   :  { %1398 = vmatpush1.bf16.msra.mxu0 %v3638_v18  ;;  %1562 = vmatpush1.bf16.msra.mxu1 %v3641_v19  ;;  %v3731_v18 = vld [vmem:[#allocation7] ss:$16 sps:$4 sm:$0xff]   ;;  %v3734_v19 = vld [vmem:[#allocation7 + $0x8] ss:$16 sps:$4 sm:$0xff]  }
  0xd5   :  { %1399 = vmatprep.subr.bf16.mxu0 %v3646_v20  ;;  %1563 = vmatprep.subr.bf16.mxu1 %v3649_v21  ;;  %v3742_v20 = vld [vmem:[#allocation7 + $0x2c] ss:$16 sps:$4 sm:$0xff]   ;;  %v3737_v21 = vld [vmem:[#allocation7 + $0x20] ss:$16 sps:$4 sm:$0xff]  }
  0xd8   :  { %1400 = vmatpush1.bf16.msra.mxu0 %v3644_v22  ;;  %1564 = vmatpush1.bf16.msra.mxu1 %v3647_v23  ;;  %v3740_v22 = vld [vmem:[#allocation7 + $0x28] ss:$16 sps:$4 sm:$0xff]   ;;  %v3745_v23 = vld [vmem:[#allocation7 + $0x44] ss:$16 sps:$4 sm:$0xff]  }
  0xd9   :  { %1401 = vmatprep.subr.bf16.mxu0 %v3652_v24  ;;  %1565 = vmatprep.subr.bf16.mxu1 %v3655_v25  ;;  %v3748_v24 = vld [vmem:[#allocation7 + $0x4c] ss:$16 sps:$4 sm:$0xff]   ;;  %v3743_v25 = vld [vmem:[#allocation7 + $0x40] ss:$16 sps:$4 sm:$0xff]  }
  0xdc   :  { %1402 = vmatpush1.bf16.msra.mxu0 %v3650_v26  ;;  %1566 = vmatpush1.bf16.msra.mxu1 %v3653_v27  ;;  %v3746_v26 = vld [vmem:[#allocation7 + $0x48] ss:$16 sps:$4 sm:$0xff]   ;;  %v3751_v27 = vld [vmem:[#allocation7 + $0x64] ss:$16 sps:$4 sm:$0xff]  }
  0xdd   :  { %1403 = vmatprep.subr.bf16.mxu0 %v3658_v28  ;;  %1567 = vmatprep.subr.bf16.mxu1 %v3661_v29  ;;  %v3754_v28 = vld [vmem:[#allocation7 + $0x6c] ss:$16 sps:$4 sm:$0xff]   ;;  %v3749_v29 = vld [vmem:[#allocation7 + $0x60] ss:$16 sps:$4 sm:$0xff]  }
  0xe0   :  { %1404 = vmatpush1.bf16.msra.mxu0 %v3656_v30  ;;  %1568 = vmatpush1.bf16.msra.mxu1 %v3659_v31  ;;  %v3752_v30 = vld [vmem:[#allocation7 + $0x68] ss:$16 sps:$4 sm:$0xff]   ;;  %v3757_v31 = vld [vmem:[#allocation7 + $0x84] ss:$16 sps:$4 sm:$0xff]  }
  0xe1   :  { %1405 = vmatprep.subr.bf16.mxu0 %v3664_v32  ;;  %1569 = vmatprep.subr.bf16.mxu1 %v3667_v33  ;;  %v3760_v32 = vld [vmem:[#allocation7 + $0x8c] ss:$16 sps:$4 sm:$0xff]   ;;  %v3755_v33 = vld [vmem:[#allocation7 + $0x80] ss:$16 sps:$4 sm:$0xff]  }
  0xe4   :  { %1406 = vmatpush1.bf16.msra.mxu0 %v3662_v34  ;;  %1570 = vmatpush1.bf16.msra.mxu1 %v3665_v35  ;;  %v3758_v34 = vld [vmem:[#allocation7 + $0x88] ss:$16 sps:$4 sm:$0xff]   ;;  %v3763_v35 = vld [vmem:[#allocation7 + $0xa4] ss:$16 sps:$4 sm:$0xff]  }
  0xe5   :  { %1407 = vmatprep.subr.bf16.mxu0 %v3670_v36  ;;  %1571 = vmatprep.subr.bf16.mxu1 %v3673_v37  ;;  %v3766_v36 = vld [vmem:[#allocation7 + $0xac] ss:$16 sps:$4 sm:$0xff]   ;;  %v3761_v37 = vld [vmem:[#allocation7 + $0xa0] ss:$16 sps:$4 sm:$0xff]  }
  0xe8   :  { %1408 = vmatpush1.bf16.msra.mxu0 %v3668_v38  ;;  %1572 = vmatpush1.bf16.msra.mxu1 %v3671_v39  ;;  %v3764_v38 = vld [vmem:[#allocation7 + $0xa8] ss:$16 sps:$4 sm:$0xff]   ;;  %v3769_v39 = vld [vmem:[#allocation7 + $0xc4] ss:$16 sps:$4 sm:$0xff]  }
  0xe9   :  { %1409 = vmatprep.subr.bf16.mxu0 %v3676_v40  ;;  %1573 = vmatprep.subr.bf16.mxu1 %v3679_v41  ;;  %v3772_v40 = vld [vmem:[#allocation7 + $0xcc] ss:$16 sps:$4 sm:$0xff]   ;;  %v3767_v41 = vld [vmem:[#allocation7 + $0xc0] ss:$16 sps:$4 sm:$0xff]  }
  0xec   :  { %1410 = vmatpush1.bf16.msra.mxu0 %v3674_v42  ;;  %1574 = vmatpush1.bf16.msra.mxu1 %v3677_v43  ;;  %v3770_v42 = vld [vmem:[#allocation7 + $0xc8] ss:$16 sps:$4 sm:$0xff]   ;;  %v3775_v43 = vld [vmem:[#allocation7 + $0xe4] ss:$16 sps:$4 sm:$0xff]  }
  0xed   :  { %1411 = vmatprep.subr.bf16.mxu0 %v3682_v44  ;;  %1575 = vmatprep.subr.bf16.mxu1 %v3685_v45  ;;  %v3778_v44 = vld [vmem:[#allocation7 + $0xec] ss:$16 sps:$4 sm:$0xff]   ;;  %v3773_v45 = vld [vmem:[#allocation7 + $0xe0] ss:$16 sps:$4 sm:$0xff]  }
  0xf0   :  { %1412 = vmatpush1.bf16.msra.mxu0 %v3680_v46  ;;  %1576 = vmatpush1.bf16.msra.mxu1 %v3683_v47  ;;  %v3776_v46 = vld [vmem:[#allocation7 + $0xe8] ss:$16 sps:$4 sm:$0xff]   ;;  %v3781_v47 = vld [vmem:[#allocation7 + $0x104] ss:$16 sps:$4 sm:$0xff]  }
  0xf1   :  { %1413 = vmatprep.subr.bf16.mxu0 %v3688_v48  ;;  %1577 = vmatprep.subr.bf16.mxu1 %v3691_v49  ;;  %v3784_v48 = vld [vmem:[#allocation7 + $0x10c] ss:$16 sps:$4 sm:$0xff]   ;;  %v3779_v49 = vld [vmem:[#allocation7 + $0x100] ss:$16 sps:$4 sm:$0xff]  }
  0xf4   :  { %1414 = vmatpush1.bf16.msra.mxu0 %v3686_v50  ;;  %1578 = vmatpush1.bf16.msra.mxu1 %v3689_v51  ;;  %v3782_v50 = vld [vmem:[#allocation7 + $0x108] ss:$16 sps:$4 sm:$0xff]   ;;  %v3787_v51 = vld [vmem:[#allocation7 + $0x124] ss:$16 sps:$4 sm:$0xff]  }
  0xf5   :  { %1415 = vmatprep.subr.bf16.mxu0 %v3694_v52  ;;  %1579 = vmatprep.subr.bf16.mxu1 %v3697_v53  ;;  %v3790_v52 = vld [vmem:[#allocation7 + $0x12c] ss:$16 sps:$4 sm:$0xff]   ;;  %v3785_v53 = vld [vmem:[#allocation7 + $0x120] ss:$16 sps:$4 sm:$0xff]  }
  0xf8   :  { %1416 = vmatpush1.bf16.msra.mxu0 %v3692_v54  ;;  %1580 = vmatpush1.bf16.msra.mxu1 %v3695_v55  ;;  %v3788_v54 = vld [vmem:[#allocation7 + $0x128] ss:$16 sps:$4 sm:$0xff]   ;;  %v3793_v55 = vld [vmem:[#allocation7 + $0x144] ss:$16 sps:$4 sm:$0xff]  }
  0xf9   :  { %1417 = vmatprep.subr.bf16.mxu0 %v3700_v56  ;;  %1581 = vmatprep.subr.bf16.mxu1 %v3703_v57  ;;  %v3796_v56 = vld [vmem:[#allocation7 + $0x14c] ss:$16 sps:$4 sm:$0xff]   ;;  %v3791_v57 = vld [vmem:[#allocation7 + $0x140] ss:$16 sps:$4 sm:$0xff]  }
  0xfc   :  { %1418 = vmatpush1.bf16.msra.mxu0 %v3698_v58  ;;  %1582 = vmatpush1.bf16.msra.mxu1 %v3701_v59  ;;  %v3794_v58 = vld [vmem:[#allocation7 + $0x148] ss:$16 sps:$4 sm:$0xff]   ;;  %v3799_v59 = vld [vmem:[#allocation7 + $0x164] ss:$16 sps:$4 sm:$0xff]  }
  0xfd   :  { %1419 = vmatprep.subr.bf16.mxu0 %v3706_v60  ;;  %1583 = vmatprep.subr.bf16.mxu1 %v3709_v61  ;;  %v3802_v60 = vld [vmem:[#allocation7 + $0x16c] ss:$16 sps:$4 sm:$0xff]   ;;  %v3797_v61 = vld [vmem:[#allocation7 + $0x160] ss:$16 sps:$4 sm:$0xff]  }
 0x100   :  { %1420 = vmatpush1.bf16.msra.mxu0 %v3704_v62  ;;  %1584 = vmatpush1.bf16.msra.mxu1 %v3707_v63  ;;  %v3800_v62 = vld [vmem:[#allocation7 + $0x168] ss:$16 sps:$4 sm:$0xff]   ;;  %v3805_v63 = vld [vmem:[#allocation7 + $0x184] ss:$16 sps:$4 sm:$0xff]  }
 0x101   :  { %1421 = vmatprep.subr.bf16.mxu0 %v3712_v0  ;;  %1585 = vmatprep.subr.bf16.mxu1 %v3715_v1  ;;  %v3808_v0 = vld [vmem:[#allocation7 + $0x18c] ss:$16 sps:$4 sm:$0xff]   ;;  %v3803_v1 = vld [vmem:[#allocation7 + $0x180] ss:$16 sps:$4 sm:$0xff]  }
 0x104   :  { %1422 = vmatpush1.bf16.msra.mxu0 %v3710_v2  ;;  %1586 = vmatpush1.bf16.msra.mxu1 %v3713_v3  ;;  %v3806_v2 = vld [vmem:[#allocation7 + $0x188] ss:$16 sps:$4 sm:$0xff]   ;;  %v3811_v3 = vld [vmem:[#allocation7 + $0x1a4] ss:$16 sps:$4 sm:$0xff]  }
 0x105   :  { %1423 = vmatprep.subr.bf16.mxu0 %v3718_v4  ;;  %1587 = vmatprep.subr.bf16.mxu1 %v3721_v5  ;;  %v3814_v4 = vld [vmem:[#allocation7 + $0x1ac] ss:$16 sps:$4 sm:$0xff]   ;;  %v3809_v5 = vld [vmem:[#allocation7 + $0x1a0] ss:$16 sps:$4 sm:$0xff]  }
 0x108   :  { %1424 = vmatpush1.bf16.msra.mxu0 %v3716_v6  ;;  %1588 = vmatpush1.bf16.msra.mxu1 %v3719_v7  ;;  %v3812_v6 = vld [vmem:[#allocation7 + $0x1a8] ss:$16 sps:$4 sm:$0xff]   ;;  %v3817_v7 = vld [vmem:[#allocation7 + $0x1c4] ss:$16 sps:$4 sm:$0xff]  }
 0x109   :  { %1434 = vmatprep.subr.bf16.mxu0 %v3726_v8  ;;  %1598 = vmatprep.subr.bf16.mxu1 %v3729_v9  ;;  %v3820_v8 = vld [vmem:[#allocation7 + $0x1cc] ss:$16 sps:$4 sm:$0xff]   ;;  %v3815_v9 = vld [vmem:[#allocation7 + $0x1c0] ss:$16 sps:$4 sm:$0xff]  }
 0x10b   :  { %1426 = vmatmul.mubr.bf16.vlgmr.msra.gmra.mrb[0].mxu0 %v2974_v13  ;;  %1590 = vmatmul.mubr.bf16.vlgmr.msra.gmra.mrb[0].mxu1 %v2974_v13  ;;  %v3826_v13 = vld [vmem:[#allocation7 + $0x1ec] ss:$16 sps:$4 sm:$0xff]  }
 0x10c   :  { %1435 = vmatpush1.bf16.msra.mxu0 %v3724_v10  ;;  %1599 = vmatpush1.bf16.msra.mxu1 %v3727_v12  ;;  %v3818_v10 = vld [vmem:[#allocation7 + $0x1c8] ss:$16 sps:$4 sm:$0xff]   ;;  %v3823_v12 = vld [vmem:[#allocation7 + $0x1e4] ss:$16 sps:$4 sm:$0xff]  }
 0x10d   :  { %1466 = vmatprep.mubr.bf16.mxu0 %v4081_v16  ;;  %1630 = vmatprep.mubr.bf16.mxu1 %v4081_v16  ;;  %v3829_v16 = vld [vmem:[#allocation7 + $0x204] ss:$16 sps:$4 sm:$0xff]  }
 0x10e   :  { %2437 = vmatprep.subr.bf16.mxu0 %v3733_v14  ;;  %2519 = vmatprep.subr.bf16.mxu1 %v3736_v15  ;;  %v3821_v14 = vld [vmem:[#allocation7 + $0x1e0] ss:$16 sps:$4 sm:$0xff]   ;;  %v3824_v15 = vld [vmem:[#allocation7 + $0x1e8] ss:$16 sps:$4 sm:$0xff]  }
 0x117   :  { %3173 = vmatmul.mubr.msk.bf16.vlgmr.msra.gmra.mrb[0].mxu0 %vm1307_vm0, %v3730_v17  ;;  %3174 = vmatmul.mubr.msk.bf16.vlgmr.msra.gmra.mrb[0].mxu1 %vm1307_vm0, %v3730_v17  ;;  %v3832_v17 = vld [vmem:[#allocation7 + $0x20c] ss:$16 sps:$4 sm:$0xff]  }
 0x118   :  { %2438 = vmatpush1.bf16.msra.mxu0 %v3731_v18  ;;  %2520 = vmatpush1.bf16.msra.mxu1 %v3734_v19  ;;  %v283_v18 = vlaneseq }
 0x119   :  { %2439 = vmatprep.subr.bf16.mxu0 %v3739_v11  ;;  %2521 = vmatprep.subr.bf16.mxu1 %v3742_v20  ;;  %v4195_v20 = vld [vmem:[%s4243_s2] sm:$0xf] }
 0x11a   :  { %v4189_v19 = vshrl.u32 %v283_v18, 7  ;;  %v3889_v18 = vld [vmem:[#allocation7 + $0x344] ss:$16 sps:$4 sm:$0xff]  }
 0x11c   :  { %2440 = vmatpush1.bf16.msra.mxu0 %v3737_v21  ;;  %2522 = vmatpush1.bf16.msra.mxu1 %v3740_v22  ;;  %v285_v11 = vsub.s32 0, %v4189_v19  ;;  %v289_v21 = vsub.s32 1, %v4189_v19  ;;  %v297_v22 = vsub.s32 3, %v4189_v19 }
 0x11d   :  { %2441 = vmatprep.subr.bf16.mxu0 %v3745_v23  ;;  %2523 = vmatprep.subr.bf16.mxu1 %v3748_v24 }
 0x11e   :  { %v286_v23 = vrot.slane %v4195_v20, %v285_v11  ;;  %v290_v24 = vrot.slane %v4195_v20, %v289_v21 }
 0x120   :  { %2442 = vmatpush1.bf16.msra.mxu0 %v3743_v25  ;;  %2524 = vmatpush1.bf16.msra.mxu1 %v3746_v26  ;;  %v298_v25 = vrot.slane %v4195_v20, %v297_v22 }
 0x121   :  { %2443 = vmatprep.subr.bf16.mxu0 %v3751_v27  ;;  %2525 = vmatprep.subr.bf16.mxu1 %v3754_v28 }
 0x124   :  { %2444 = vmatpush1.bf16.msra.mxu0 %v3749_v29  ;;  %2526 = vmatpush1.bf16.msra.mxu1 %v3752_v30 }
 0x125   :  { %2445 = vmatprep.subr.bf16.mxu0 %v3757_v31  ;;  %2527 = vmatprep.subr.bf16.mxu1 %v3760_v32 }
 0x128   :  { %2446 = vmatpush1.bf16.msra.mxu0 %v3755_v33  ;;  %2528 = vmatpush1.bf16.msra.mxu1 %v3758_v34 }
 0x129   :  { %2447 = vmatprep.subr.bf16.mxu0 %v3763_v35  ;;  %2529 = vmatprep.subr.bf16.mxu1 %v3766_v36 }
 0x12c   :  { %2448 = vmatpush1.bf16.msra.mxu0 %v3761_v37  ;;  %2530 = vmatpush1.bf16.msra.mxu1 %v3764_v38 }
 0x12d   :  { %2449 = vmatprep.subr.bf16.mxu0 %v3769_v39  ;;  %2531 = vmatprep.subr.bf16.mxu1 %v3772_v40 }
 0x130   :  { %2450 = vmatpush1.bf16.msra.mxu0 %v3767_v41  ;;  %2532 = vmatpush1.bf16.msra.mxu1 %v3770_v42  ;;  %v3827_v41 = vld [vmem:[#allocation7 + $0x200] ss:$16 sps:$4 sm:$0xff]   ;;  %v3830_v42 = vld [vmem:[#allocation7 + $0x208] ss:$16 sps:$4 sm:$0xff]  }
 0x131   :  { %2451 = vmatprep.subr.bf16.mxu0 %v3775_v43  ;;  %2533 = vmatprep.subr.bf16.mxu1 %v3778_v44  ;;  %v3835_v44 = vld [vmem:[#allocation7 + $0x224] ss:$16 sps:$4 sm:$0xff]  }
 0x134   :  { %2452 = vmatpush1.bf16.msra.mxu0 %v3773_v45  ;;  %2534 = vmatpush1.bf16.msra.mxu1 %v3776_v46  ;;  %v3838_v45 = vld [vmem:[#allocation7 + $0x22c] ss:$16 sps:$4 sm:$0xff]  }
 0x135   :  { %2453 = vmatprep.subr.bf16.mxu0 %v3781_v47  ;;  %2535 = vmatprep.subr.bf16.mxu1 %v3784_v48  ;;  %v3833_v47 = vld [vmem:[#allocation7 + $0x220] ss:$16 sps:$4 sm:$0xff]   ;;  %v3836_v48 = vld [vmem:[#allocation7 + $0x228] ss:$16 sps:$4 sm:$0xff]  }
 0x138   :  { %2454 = vmatpush1.bf16.msra.mxu0 %v3779_v49  ;;  %2536 = vmatpush1.bf16.msra.mxu1 %v3782_v50  ;;  %v3841_v49 = vld [vmem:[#allocation7 + $0x244] ss:$16 sps:$4 sm:$0xff]   ;;  %v3844_v50 = vld [vmem:[#allocation7 + $0x24c] ss:$16 sps:$4 sm:$0xff]  }
 0x139   :  { %2455 = vmatprep.subr.bf16.mxu0 %v3787_v51  ;;  %2537 = vmatprep.subr.bf16.mxu1 %v3790_v52  ;;  %v3839_v51 = vld [vmem:[#allocation7 + $0x240] ss:$16 sps:$4 sm:$0xff]   ;;  %v3842_v52 = vld [vmem:[#allocation7 + $0x248] ss:$16 sps:$4 sm:$0xff]  }
 0x13c   :  { %2456 = vmatpush1.bf16.msra.mxu0 %v3785_v53  ;;  %2538 = vmatpush1.bf16.msra.mxu1 %v3788_v54  ;;  %v3847_v53 = vld [vmem:[#allocation7 + $0x264] ss:$16 sps:$4 sm:$0xff]   ;;  %v3850_v54 = vld [vmem:[#allocation7 + $0x26c] ss:$16 sps:$4 sm:$0xff]  }
 0x13d   :  { %2457 = vmatprep.subr.bf16.mxu0 %v3793_v55  ;;  %2539 = vmatprep.subr.bf16.mxu1 %v3796_v56  ;;  %v3845_v55 = vld [vmem:[#allocation7 + $0x260] ss:$16 sps:$4 sm:$0xff]   ;;  %v3848_v56 = vld [vmem:[#allocation7 + $0x268] ss:$16 sps:$4 sm:$0xff]  }
 0x140   :  { %2458 = vmatpush1.bf16.msra.mxu0 %v3791_v57  ;;  %2540 = vmatpush1.bf16.msra.mxu1 %v3794_v58  ;;  %v3853_v57 = vld [vmem:[#allocation7 + $0x284] ss:$16 sps:$4 sm:$0xff]   ;;  %v3856_v58 = vld [vmem:[#allocation7 + $0x28c] ss:$16 sps:$4 sm:$0xff]  }
 0x141   :  { %2459 = vmatprep.subr.bf16.mxu0 %v3799_v59  ;;  %2541 = vmatprep.subr.bf16.mxu1 %v3802_v60  ;;  %v3851_v59 = vld [vmem:[#allocation7 + $0x280] ss:$16 sps:$4 sm:$0xff]   ;;  %v3854_v60 = vld [vmem:[#allocation7 + $0x288] ss:$16 sps:$4 sm:$0xff]  }
 0x144   :  { %2460 = vmatpush1.bf16.msra.mxu0 %v3797_v61  ;;  %2542 = vmatpush1.bf16.msra.mxu1 %v3800_v62  ;;  %v3859_v61 = vld [vmem:[#allocation7 + $0x2a4] ss:$16 sps:$4 sm:$0xff]   ;;  %v3862_v62 = vld [vmem:[#allocation7 + $0x2ac] ss:$16 sps:$4 sm:$0xff]  }
 0x145   :  { %2461 = vmatprep.subr.bf16.mxu0 %v3805_v63  ;;  %2543 = vmatprep.subr.bf16.mxu1 %v3808_v0  ;;  %v3857_v63 = vld [vmem:[#allocation7 + $0x2a0] ss:$16 sps:$4 sm:$0xff]   ;;  %v3860_v0 = vld [vmem:[#allocation7 + $0x2a8] ss:$16 sps:$4 sm:$0xff]  }
 0x148   :  { %2462 = vmatpush1.bf16.msra.mxu0 %v3803_v1  ;;  %2544 = vmatpush1.bf16.msra.mxu1 %v3806_v2  ;;  %v3865_v1 = vld [vmem:[#allocation7 + $0x2c4] ss:$16 sps:$4 sm:$0xff]   ;;  %v3868_v2 = vld [vmem:[#allocation7 + $0x2cc] ss:$16 sps:$4 sm:$0xff]  }
 0x149   :  { %2463 = vmatprep.subr.bf16.mxu0 %v3811_v3  ;;  %2545 = vmatprep.subr.bf16.mxu1 %v3814_v4  ;;  %v3863_v3 = vld [vmem:[#allocation7 + $0x2c0] ss:$16 sps:$4 sm:$0xff]   ;;  %v3866_v4 = vld [vmem:[#allocation7 + $0x2c8] ss:$16 sps:$4 sm:$0xff]  }
 0x14c   :  { %2464 = vmatpush1.bf16.msra.mxu0 %v3809_v5  ;;  %2546 = vmatpush1.bf16.msra.mxu1 %v3812_v6  ;;  %v3871_v5 = vld [vmem:[#allocation7 + $0x2e4] ss:$16 sps:$4 sm:$0xff]   ;;  %v3874_v6 = vld [vmem:[#allocation7 + $0x2ec] ss:$16 sps:$4 sm:$0xff]  }
 0x14d   :  { %2465 = vmatprep.subr.bf16.mxu0 %v3817_v7  ;;  %2547 = vmatprep.subr.bf16.mxu1 %v3820_v8  ;;  %v3869_v7 = vld [vmem:[#allocation7 + $0x2e0] ss:$16 sps:$4 sm:$0xff]   ;;  %v3872_v8 = vld [vmem:[#allocation7 + $0x2e8] ss:$16 sps:$4 sm:$0xff]  }
 0x150   :  { %2466 = vmatpush1.bf16.msra.mxu0 %v3815_v9  ;;  %2548 = vmatpush1.bf16.msra.mxu1 %v3818_v10  ;;  %v3877_v9 = vld [vmem:[#allocation7 + $0x304] ss:$16 sps:$4 sm:$0xff]   ;;  %v3880_v10 = vld [vmem:[#allocation7 + $0x30c] ss:$16 sps:$4 sm:$0xff]  }
 0x151   :  { %2467 = vmatprep.subr.bf16.mxu0 %v3823_v12  ;;  %2549 = vmatprep.subr.bf16.mxu1 %v3826_v13  ;;  %v3875_v12 = vld [vmem:[#allocation7 + $0x300] ss:$16 sps:$4 sm:$0xff]   ;;  %v3878_v13 = vld [vmem:[#allocation7 + $0x308] ss:$16 sps:$4 sm:$0xff]  }
 0x154   :  { %2468 = vmatpush1.bf16.msra.mxu0 %v3821_v14  ;;  %2550 = vmatpush1.bf16.msra.mxu1 %v3824_v15  ;;  %v3883_v14 = vld [vmem:[#allocation7 + $0x324] ss:$16 sps:$4 sm:$0xff]   ;;  %v3886_v15 = vld [vmem:[#allocation7 + $0x32c] ss:$16 sps:$4 sm:$0xff]  }
 0x155   :  { %2478 = vmatprep.subr.bf16.mxu0 %v3829_v16  ;;  %2560 = vmatprep.subr.bf16.mxu1 %v3832_v17  ;;  %v3881_v16 = vld [vmem:[#allocation7 + $0x320] ss:$16 sps:$4 sm:$0xff]   ;;  %v3884_v17 = vld [vmem:[#allocation7 + $0x328] ss:$16 sps:$4 sm:$0xff]  }
 0x1ea   :  { %v1468_v26 = vpop.f32.mrb[0].mxu0  ;;  %v4208_v27 = vpop.f32.mrb[0].mxu1 }
 0x1eb   :  { %v3380_v28 = vadd.f32 %v1468_v26, %v286_v23  ;;  %v1470_v29 = vpop.f32.mrb[1].mxu0  ;;  %v1634_v30 = vpop.f32.mrb[1].mxu1  ;;  %v3892_v23 = vld [vmem:[#allocation7 + $0x34c] ss:$16 sps:$4 sm:$0xff]   ;;  %v3895_v26 = vld [vmem:[#allocation7 + $0x364] ss:$16 sps:$4 sm:$0xff]  }
 0x1ec   :  { %v3381_v31 = vadd.f32 %v1470_v29, %v290_v24  ;;  %v3383_v32 = vadd.f32 %v1634_v30, %v298_v25  ;;  %v1472_v33 = vpop.f32.mrb[2].mxu0  ;;  %v1636_v34 = vpop.f32.mrb[2].mxu1  ;;  %v3887_v24 = vld [vmem:[#allocation7 + $0x340] ss:$16 sps:$4 sm:$0xff]   ;;  %v3890_v25 = vld [vmem:[#allocation7 + $0x348] ss:$16 sps:$4 sm:$0xff]  }
 0x1ed   :  { %v1639_v35 = vmax.f32 %v3380_v28, 0.0  ;;  %v1473_v36 = vpop.f32.mrb[3].mxu0  ;;  %v1637_v37 = vpop.f32.mrb[3].mxu1  ;;  %v3898_v28 = vld [vmem:[#allocation7 + $0x36c] ss:$16 sps:$4 sm:$0xff]  }
 0x1ee   :  { %v1640_v38 = vmax.f32 %v3381_v31, 0.0  ;;  %v1642_v39 = vmax.f32 %v3383_v32, 0.0  ;;  %v3893_v29 = vld [vmem:[#allocation7 + $0x360] ss:$16 sps:$4 sm:$0xff]   ;;  %v3896_v30 = vld [vmem:[#allocation7 + $0x368] ss:$16 sps:$4 sm:$0xff]  }
 0x1ef   :  { %v1643_v43 = vpack.c.bf16 %v1639_v35, %v1639_v35  ;;  %v3901_v31 = vld [vmem:[#allocation7 + $0x384] ss:$16 sps:$4 sm:$0xff]   ;;  %v3904_v32 = vld [vmem:[#allocation7 + $0x38c] ss:$16 sps:$4 sm:$0xff]   ;;  %v3899_v33 = vld [vmem:[#allocation7 + $0x380] ss:$16 sps:$4 sm:$0xff]  }
 0x1f0   :  { %v1644_v40 = vpack.c.bf16 %v1640_v38, %v1640_v38  ;;  %v1646_v46 = vpack.c.bf16 %v1642_v39, %v1642_v39  ;;  %v3902_v34 = vld [vmem:[#allocation7 + $0x388] ss:$16 sps:$4 sm:$0xff]   ;;  %v293_v35 = vsub.s32 2, %v4189_v19  ;;  %v3907_v36 = vld [vmem:[#allocation7 + $0x3a4] ss:$16 sps:$4 sm:$0xff]  }
 0x1f1   :  { %v3910_v37 = vld [vmem:[#allocation7 + $0x3ac] ss:$16 sps:$4 sm:$0xff]   ;;  %v3905_v38 = vld [vmem:[#allocation7 + $0x3a0] ss:$16 sps:$4 sm:$0xff]   ;;  %v3908_v39 = vld [vmem:[#allocation7 + $0x3a8] ss:$16 sps:$4 sm:$0xff]  }
 0x1f2   :  { %2469 = vmatprep.mubr.bf16.mxu0 %v1644_v40  ;;  %2551 = vmatprep.mubr.bf16.mxu1 %v1644_v40  ;;  %v294_v40 = vrot.slane %v4195_v20, %v293_v35  ;;  %v3923_v20 = vld [vmem:[#allocation8 + $0x40] sm:$0xff]  }
 0x1f3   :  { %2470 = vmatmul.mubr.bf16.vlgmr.msra.gmra.mrb[4].mxu0 %v1643_v43  ;;  %2552 = vmatmul.mubr.bf16.vlgmr.msra.gmra.mrb[4].mxu1 %v1643_v43  ;;  %v3911_v43 = vld [vmem:[#allocation7 + $0x3c0] ss:$16 sps:$4 sm:$0xff]  }
 0x1f4   :  { %2479 = vmatpush1.bf16.msra.mxu0 %v3827_v41  ;;  %2561 = vmatpush1.bf16.msra.mxu1 %v3830_v42  ;;  %v3913_v41 = vld [vmem:[#allocation7 + $0x3c4] ss:$16 sps:$4 sm:$0xff]   ;;  %v3916_v42 = vld [vmem:[#allocation7 + $0x3cc] ss:$16 sps:$4 sm:$0xff]  }
 0x1f5   :  { %2510 = vmatprep.mubr.bf16.mxu0 %v1646_v46  ;;  %2592 = vmatprep.mubr.bf16.mxu1 %v1646_v46  ;;  %v3919_v46 = vld [vmem:[#allocation7 + $0x3e4] ss:$16 sps:$4 sm:$0xff]  }
 0x1f6   :  { %2480 = vmatprep.subr.bf16.mxu0 %v3835_v44  ;;  %2562 = vmatprep.subr.bf16.mxu1 %v3838_v45  ;;  %v3914_v44 = vld [vmem:[#allocation7 + $0x3c8] ss:$16 sps:$4 sm:$0xff]   ;;  %v3382_v45 = vadd.f32 %v4208_v27, %v294_v40 }
 0x1f7   :  { %v3927_v27 = vld [vmem:[#allocation8 + $0x48] sm:$0xff]  }
 0x1f8   :  { %2481 = vmatpush1.bf16.msra.mxu0 %v3833_v47  ;;  %2563 = vmatpush1.bf16.msra.mxu1 %v3836_v48  ;;  %v3922_v47 = vld [vmem:[#allocation7 + $0x3ec] ss:$16 sps:$4 sm:$0xff]   ;;  %v3917_v48 = vld [vmem:[#allocation7 + $0x3e0] ss:$16 sps:$4 sm:$0xff]  }
 0x1f9   :  { %2482 = vmatprep.subr.bf16.mxu0 %v3841_v49  ;;  %2564 = vmatprep.subr.bf16.mxu1 %v3844_v50  ;;  %v3920_v49 = vld [vmem:[#allocation7 + $0x3e8] ss:$16 sps:$4 sm:$0xff]   ;;  %v1641_v50 = vmax.f32 %v3382_v45, 0.0 }
 0x1fc   :  { %2483 = vmatpush1.bf16.msra.mxu0 %v3839_v51  ;;  %2565 = vmatpush1.bf16.msra.mxu1 %v3842_v52  ;;  %v3924_v51 = vld [vmem:[#allocation8 + $0xc0] sm:$0xff]  }
 0x1fd   :  { %2484 = vmatprep.subr.bf16.mxu0 %v3847_v53  ;;  %2566 = vmatprep.subr.bf16.mxu1 %v3850_v54  ;;  %v3925_v52 = vld [vmem:[#allocation8] sm:$0xff]   ;;  %v1645_v54 = vpack.c.bf16 %v1641_v50, %v1641_v50 }
 0x1fe   :  { %v3926_v53 = vld [vmem:[#allocation8 + $0x80] sm:$0xff]  }
 0x200   :  { %2485 = vmatpush1.bf16.msra.mxu0 %v3845_v55  ;;  %2567 = vmatpush1.bf16.msra.mxu1 %v3848_v56  ;;  %v3928_v55 = vld [vmem:[#allocation8 + $0xc8] sm:$0xff]  }
 0x201   :  { %2486 = vmatprep.subr.bf16.mxu0 %v3853_v57  ;;  %2568 = vmatprep.subr.bf16.mxu1 %v3856_v58  ;;  %v3929_v56 = vld [vmem:[#allocation8 + $0x8] sm:$0xff]   ;;  %v3931_v58 = vld [vmem:[#allocation8 + $0x50] sm:$0xff]  }
 0x202   :  { %v3930_v57 = vld [vmem:[#allocation8 + $0x88] sm:$0xff]  }
 0x204   :  { %2487 = vmatpush1.bf16.msra.mxu0 %v3851_v59  ;;  %2569 = vmatpush1.bf16.msra.mxu1 %v3854_v60  ;;  %v3932_v59 = vld [vmem:[#allocation8 + $0xd0] sm:$0xff]  }
 0x205   :  { %2488 = vmatprep.subr.bf16.mxu0 %v3859_v61  ;;  %2570 = vmatprep.subr.bf16.mxu1 %v3862_v62  ;;  %v3933_v60 = vld [vmem:[#allocation8 + $0x10] sm:$0xff]   ;;  %v3935_v62 = vld [vmem:[#allocation8 + $0x58] sm:$0xff]  }
 0x206   :  { %v3934_v61 = vld [vmem:[#allocation8 + $0x90] sm:$0xff]  }
 0x208   :  { %2489 = vmatpush1.bf16.msra.mxu0 %v3857_v63  ;;  %2571 = vmatpush1.bf16.msra.mxu1 %v3860_v0  ;;  %v3936_v63 = vld [vmem:[#allocation8 + $0xd8] sm:$0xff]  }
 0x209   :  { %2490 = vmatprep.subr.bf16.mxu0 %v3865_v1  ;;  %2572 = vmatprep.subr.bf16.mxu1 %v3868_v2  ;;  %v3937_v0 = vld [vmem:[#allocation8 + $0x18] sm:$0xff]   ;;  %v3939_v2 = vld [vmem:[#allocation8 + $0x60] sm:$0xff]  }
 0x20a   :  { %v3938_v1 = vld [vmem:[#allocation8 + $0x98] sm:$0xff]  }
 0x20c   :  { %2491 = vmatpush1.bf16.msra.mxu0 %v3863_v3  ;;  %2573 = vmatpush1.bf16.msra.mxu1 %v3866_v4  ;;  %v3940_v3 = vld [vmem:[#allocation8 + $0xe0] sm:$0xff]  }
 0x20d   :  { %2492 = vmatprep.subr.bf16.mxu0 %v3871_v5  ;;  %2574 = vmatprep.subr.bf16.mxu1 %v3874_v6  ;;  %v3941_v4 = vld [vmem:[#allocation8 + $0x20] sm:$0xff]   ;;  %v3943_v6 = vld [vmem:[#allocation8 + $0x68] sm:$0xff]  }
 0x20e   :  { %v3942_v5 = vld [vmem:[#allocation8 + $0xa0] sm:$0xff]  }
 0x210   :  { %2493 = vmatpush1.bf16.msra.mxu0 %v3869_v7  ;;  %2575 = vmatpush1.bf16.msra.mxu1 %v3872_v8  ;;  %v3944_v7 = vld [vmem:[#allocation8 + $0xe8] sm:$0xff]  }
 0x211   :  { %2494 = vmatprep.subr.bf16.mxu0 %v3877_v9  ;;  %2576 = vmatprep.subr.bf16.mxu1 %v3880_v10  ;;  %v3945_v8 = vld [vmem:[#allocation8 + $0x28] sm:$0xff]   ;;  %v3947_v10 = vld [vmem:[#allocation8 + $0x70] sm:$0xff]  }
 0x212   :  { %v3946_v9 = vld [vmem:[#allocation8 + $0xa8] sm:$0xff]  }
 0x214   :  { %2495 = vmatpush1.bf16.msra.mxu0 %v3875_v12  ;;  %2577 = vmatpush1.bf16.msra.mxu1 %v3878_v13  ;;  %v3948_v12 = vld [vmem:[#allocation8 + $0xf0] sm:$0xff]  }
 0x215   :  { %2496 = vmatprep.subr.bf16.mxu0 %v3883_v14  ;;  %2578 = vmatprep.subr.bf16.mxu1 %v3886_v15  ;;  %v3949_v13 = vld [vmem:[#allocation8 + $0x30] sm:$0xff]   ;;  %v3951_v15 = vld [vmem:[#allocation8 + $0x78] sm:$0xff]  }
 0x216   :  { %v3950_v14 = vld [vmem:[#allocation8 + $0xb0] sm:$0xff]  }
 0x218   :  { %2497 = vmatpush1.bf16.msra.mxu0 %v3881_v16  ;;  %2579 = vmatpush1.bf16.msra.mxu1 %v3884_v17  ;;  %v3952_v16 = vld [vmem:[#allocation8 + $0xf8] sm:$0xff]  }
 0x219   :  { %2498 = vmatprep.subr.bf16.mxu0 %v3889_v18  ;;  %2580 = vmatprep.subr.bf16.mxu1 %v3892_v23  ;;  %v3953_v17 = vld [vmem:[#allocation8 + $0x38] sm:$0xff]   ;;  %v1775_v23 = vld [vmem:[%s4245_s4] sm:$0xf] }
 0x21a   :  { %v3954_v18 = vld [vmem:[#allocation8 + $0xb8] sm:$0xff]  }
 0x21c   :  { %2499 = vmatpush1.bf16.msra.mxu0 %v3887_v24  ;;  %2581 = vmatpush1.bf16.msra.mxu1 %v3890_v25  ;;  %v1780_v24 = vrot.slane %v1775_v23, %v285_v11  ;;  %v1788_v25 = vrot.slane %v1775_v23, %v293_v35 }
 0x21d   :  { %2500 = vmatprep.subr.bf16.mxu0 %v3895_v26  ;;  %2582 = vmatprep.subr.bf16.mxu1 %v3898_v28  ;;  %v1784_v26 = vrot.slane %v1775_v23, %v289_v21  ;;  %v1792_v28 = vrot.slane %v1775_v23, %v297_v22 }
 0x220   :  { %2501 = vmatpush1.bf16.msra.mxu0 %v3893_v29  ;;  %2583 = vmatpush1.bf16.msra.mxu1 %v3896_v30 }
 0x221   :  { %2502 = vmatprep.subr.bf16.mxu0 %v3901_v31  ;;  %2584 = vmatprep.subr.bf16.mxu1 %v3904_v32 }
 0x224   :  { %2503 = vmatpush1.bf16.msra.mxu0 %v3899_v33  ;;  %2585 = vmatpush1.bf16.msra.mxu1 %v3902_v34 }
 0x225   :  { %2504 = vmatprep.subr.bf16.mxu0 %v3907_v36  ;;  %2586 = vmatprep.subr.bf16.mxu1 %v3910_v37 }
 0x228   :  { %2505 = vmatpush1.bf16.msra.mxu0 %v3905_v38  ;;  %2587 = vmatpush1.bf16.msra.mxu1 %v3908_v39 }
 0x229   :  { %2506 = vmatprep.subr.bf16.mxu0 %v3913_v41  ;;  %2588 = vmatprep.subr.bf16.mxu1 %v3916_v42 }
 0x22c   :  { %2507 = vmatpush1.bf16.msra.mxu0 %v3911_v43  ;;  %2589 = vmatpush1.bf16.msra.mxu1 %v3914_v44 }
 0x22d   :  { %2508 = vmatprep.subr.bf16.mxu0 %v3919_v46  ;;  %2590 = vmatprep.subr.bf16.mxu1 %v3922_v47  ;;  %v3303_v47 = vld [vmem:[%s4247_s6] ss:$0 sm:$0xff] }
 0x230   :  { %2509 = vmatpush1.bf16.msra.mxu0 %v3917_v48  ;;  %2591 = vmatpush1.bf16.msra.mxu1 %v3920_v49 }
 0x231   :  { %3336 = vmatprep.subr.bf16.mxu0 %v3923_v20  ;;  %3358 = vmatprep.subr.bf16.mxu1 %v3924_v51 }
 0x233   :  { %2511 = vmatmul.mubr.bf16.vlgmr.msra.gmra.mrb[4].mxu0 %v1645_v54  ;;  %2593 = vmatmul.mubr.bf16.vlgmr.msra.gmra.mrb[4].mxu1 %v1645_v54 }
 0x234   :  { %3337 = vmatpush3.bf16.msra.mxu0 %v3925_v52  ;;  %3359 = vmatpush3.bf16.msra.mxu1 %v3926_v53 }
 0x235   :  { %3338 = vmatprep.subr.bf16.mxu0 %v3927_v27  ;;  %3360 = vmatprep.subr.bf16.mxu1 %v3928_v55 }
 0x238   :  { %3339 = vmatpush3.bf16.msra.mxu0 %v3929_v56  ;;  %3361 = vmatpush3.bf16.msra.mxu1 %v3930_v57 }
 0x239   :  { %3340 = vmatprep.subr.bf16.mxu0 %v3931_v58  ;;  %3362 = vmatprep.subr.bf16.mxu1 %v3932_v59 }
 0x23c   :  { %3341 = vmatpush3.bf16.msra.mxu0 %v3933_v60  ;;  %3363 = vmatpush3.bf16.msra.mxu1 %v3934_v61 }
 0x23d   :  { %3342 = vmatprep.subr.bf16.mxu0 %v3935_v62  ;;  %3364 = vmatprep.subr.bf16.mxu1 %v3936_v63 }
 0x240   :  { %3343 = vmatpush3.bf16.msra.mxu0 %v3937_v0  ;;  %3365 = vmatpush3.bf16.msra.mxu1 %v3938_v1 }
 0x241   :  { %3344 = vmatprep.subr.bf16.mxu0 %v3939_v2  ;;  %3366 = vmatprep.subr.bf16.mxu1 %v3940_v3 }
 0x244   :  { %3345 = vmatpush3.bf16.msra.mxu0 %v3941_v4  ;;  %3367 = vmatpush3.bf16.msra.mxu1 %v3942_v5 }
 0x245   :  { %3346 = vmatprep.subr.bf16.mxu0 %v3943_v6  ;;  %3368 = vmatprep.subr.bf16.mxu1 %v3944_v7 }
 0x248   :  { %3347 = vmatpush3.bf16.msra.mxu0 %v3945_v8  ;;  %3369 = vmatpush3.bf16.msra.mxu1 %v3946_v9 }
 0x249   :  { %3348 = vmatprep.subr.bf16.mxu0 %v3947_v10  ;;  %3370 = vmatprep.subr.bf16.mxu1 %v3948_v12 }
 0x24c   :  { %3349 = vmatpush3.bf16.msra.mxu0 %v3949_v13  ;;  %3371 = vmatpush3.bf16.msra.mxu1 %v3950_v14 }
 0x24d   :  { %3350 = vmatprep.subr.bf16.mxu0 %v3951_v15  ;;  %3372 = vmatprep.subr.bf16.mxu1 %v3952_v16 }
 0x250   :  { %3351 = vmatpush3.bf16.msra.mxu0 %v3953_v17  ;;  %3373 = vmatpush3.bf16.msra.mxu1 %v3954_v18 }
 0x306   :  { %v2512_v29 = vpop.f32.mrb[4].mxu0  ;;  %v2594_v30 = vpop.f32.mrb[4].mxu1 }
 0x307   :  { %v3384_v31 = vadd.f32 %v2512_v29, %v1780_v24  ;;  %v3386_v32 = vadd.f32 %v2594_v30, %v1788_v25  ;;  %v2514_v33 = vpop.f32.mrb[5].mxu0  ;;  %v2596_v34 = vpop.f32.mrb[5].mxu1 }
 0x308   :  { %v3385_v36 = vadd.f32 %v2514_v33, %v1784_v26  ;;  %v3387_v37 = vadd.f32 %v2596_v34, %v1792_v28  ;;  %v2516_v38 = vpop.f32.mrb[6].mxu0  ;;  %v2598_v39 = vpop.f32.mrb[6].mxu1 }
 0x309   :  { %v2601_v11 = vmax.f32 %v3384_v31, 0.0  ;;  %v2603_v40 = vmax.f32 %v3386_v32, 0.0  ;;  %v2517_v41 = vpop.f32.mrb[7].mxu0  ;;  %v2599_v35 = vpop.f32.mrb[7].mxu1 }
 0x30a   :  { %v2602_v42 = vmax.f32 %v3385_v36, 0.0  ;;  %v2604_v43 = vmax.f32 %v3387_v37, 0.0 }
 0x30b   :  { %v2605_v19 = vpack.c.bf16 %v2601_v11, %v2601_v11  ;;  %v2607_v22 = vpack.c.bf16 %v2603_v40, %v2603_v40 }
 0x30c   :  { %v2606_v21 = vpack.c.bf16 %v2602_v42, %v2602_v42  ;;  %v2608_v44 = vpack.c.bf16 %v2604_v43, %v2604_v43 }
 0x30e   :  { %2904 = vmatprep.mubr.bf16.mxu0 %v2606_v21  ;;  %2944 = vmatprep.mubr.bf16.mxu1 %v2608_v44 }
 0x30f   :  { %2905 = vmatmul.mubr.bf16.vlgmr.msra.gmra.mrb[8].mxu0 %v2605_v19  ;;  %2945 = vmatmul.mubr.bf16.vlgmr.msra.gmra.mrb[8].mxu1 %v2607_v22 }
 0x3e2   :  { %v3352_v45 = vpop.f32.mrb[8].mxu0  ;;  %v3374_v46 = vpop.f32.mrb[8].mxu1 }
 0x3e3   :  { %v3353_v48 = vpop.f32.mrb[9].mxu0  ;;  %v3375_v49 = vpop.f32.mrb[9].mxu1 }
 0x3e4   :  { %v3354_v50 = vadd.f32 %v3353_v48, %v3352_v45  ;;  %v3376_v20 = vadd.f32 %v3375_v49, %v3374_v46  ;;  %v3355_v51 = vpop.f32.mrb[10].mxu0  ;;  %v3377_v52 = vpop.f32.mrb[10].mxu1 }
 0x3e5   :  { %v3356_v53 = vpop.f32.mrb[11].mxu0  ;;  %v3378_v54 = vpop.f32.mrb[11].mxu1 }
 0x3e6   :  { %v2907_v27 = vadd.f32 %v3354_v50, %v3303_v47 }
 0x3e8   :  { %v2947_v55 = vadd.f32 %v3376_v20, %v2907_v27 }
 0x3ea   :  { %2952 = vst [vmem:[#allocation10] sm:$0xff] %v2947_v55 }
 0x3eb   :  { %4054 = shalt.err (!%p4051_p8)
}
 0x3ec   :  { %s4055_s10 = scalar_lea.hbm %s4248_s7, 128 }
 0x3ed   :  { %p4056_p9 = scmp.ne.s32.totalorder %s4248_s7, %s4055_s10  ;;  %p4059_p10 = scmp.lt.u32.totalorder %s4055_s10, %s4248_s7 }
 0x3ef   :  { %p4061_p11 = pnand %p4059_p10, %p4056_p9 }
 0x3f1   :  { %4064 = shalt.err (!%p4061_p11)
}
 0x3f2   :  { %2962 = dma.vmem_to_hbm [thread:$0]  %s2960_s30, 128, %s4248_s7, [#allocation4]  }
 0x3f3   :  { %4071 = dma.done.wait [#allocation4], 128  }
 0x3f4   :  { %4072 = vsyncadd [#allocation4], 4294967168 }
 0x3f5   :  { %2966 = vsyncpa [#allocation3], 1 }
 0x3f6   :  { %2967 = vsyncpa [#allocation6], 1 }
 0x3f7   :  { %2968 = vsyncpa [#allocation9], 1 }
 0x3f8   :  { %2969 = vsyncpa [#allocation4], 1 }

</bundles_post_ra>
